<compile_context>
chip_gen: v6e
topology: v6e:2x2x1
jax: 0.10.0
libtpu: 0.0.40
codegen_flags: <defaults>
</compile_context>

<pallas_src>
import functools
import numpy as np
import jax
import jax.numpy as jnp
from jax.experimental import pallas as pl
from jax.experimental.pallas import tpu as pltpu


def _round_up(x, m):
    return ((x + m - 1) // m) * m


# --------------------------------------------------------------------------
# kernel
# --------------------------------------------------------------------------
def atkt_kernel(x_ref, wih_ref, whh_ref, blstm_ref, wmlp_ref, bmlp_ref,
                wsim_ref, wfct_ref, wfcb_ref, bfc_ref,
                out_ref, xw_ref, h_ref, *, h_dim, unroll):
    """One batch block: LSTM over time, causal attention, fc + sigmoid."""
    f32, bf16 = jnp.float32, jnp.bfloat16
    S, Bblk, Din = x_ref.shape                 # time-major input block
    Hp = whh_ref.shape[0]                      # lane-padded hidden dim
    Cp = out_ref.shape[2]                      # lane-padded output dim

    # ---- hoisted input projection: xw[t] = x[t] @ Wih + b (one big matmul) --
    x_flat = x_ref[...].reshape(S * Bblk, Din)                       # bf16
    xw = jnp.dot(x_flat, wih_ref[...], preferred_element_type=f32) + blstm_ref[...]
    xw_ref[...] = xw.reshape(S, Bblk, 4 * Hp).astype(bf16)

    whh = whh_ref[...]                         # (Hp, 4Hp) bf16

    # ---- LSTM recurrence, batched over Bblk; gate order here is (i,f,o,g) --
    # Padded weight columns/rows are zero => padded hidden lanes stay exactly 0.
    def lstm_steps(i, carry):
        h, c = carry                                               # (Bblk, Hp) f32
        base = i * unroll
        for k in range(unroll):                                    # manual unroll
            t = base + k
            gates = xw_ref[t] + jnp.dot(h.astype(bf16), whh,
                                        preferred_element_type=f32)  # (Bblk,4Hp)
            sig = jax.nn.sigmoid(gates[:, :3 * Hp])                # i | f | o
            i_g = sig[:, 0 * Hp:1 * Hp]
            f_g = sig[:, 1 * Hp:2 * Hp]
            o_g = sig[:, 2 * Hp:3 * Hp]
            g_g = jnp.tanh(gates[:, 3 * Hp:])
            c = f_g * c + i_g * g_g
            h = o_g * jnp.tanh(c)
            h_ref[t] = h.astype(bf16)                              # full-slab store
        return (h, c)

    z = jnp.zeros((Bblk, Hp), f32)
    jax.lax.fori_loop(0, S // unroll, lstm_steps, (z, z))

    # ---- attention module (time-major throughout; no relayouts) ------------
    lo2 = h_ref[...].reshape(S * Bblk, Hp)                 # bf16, free reshape
    att = jnp.tanh(jnp.dot(lo2, wmlp_ref[...], preferred_element_type=f32)
                   + bmlp_ref[...])                        # (S*Bblk, Ap) f32
    # wsim replicated across 128 lanes -> w (and e) come out lane-dense,
    # already broadcast over a full lane tile.
    w_rep = jnp.dot(att.astype(bf16), wsim_ref[...],
                    preferred_element_type=f32)            # (S*Bblk, 128)
    # Global max for stabilization (softmax ratio is unchanged; tanh-bounded).
    e_rep = jnp.exp(w_rep - jnp.max(w_rep)).reshape(S, Bblk, 128)   # f32

    lo3 = h_ref[...]                                       # (S, Bblk, Hp) bf16
    reps = Hp // 128
    e_h = e_rep if reps == 1 else jnp.concatenate([e_rep] * reps, axis=-1)

    if h_dim < Hp:
        # Padded lane `h_dim` of lstm_out is exactly zero -> stash e there so
        # the softmax denominator rides along in the same prefix sum for free.
        onehot = (jax.lax.broadcasted_iota(jnp.int32, (1, 1, Hp), 2)
                  == h_dim).astype(f32)
        eh = e_h * (lo3 + onehot)                          # (S, Bblk, Hp) f32
        den_lane = h_dim
    else:
        # H is already a multiple of 128: carry the denominator in an extra
        # 128-wide lane tile instead (rare path).
        eh = jnp.concatenate([e_h * lo3, e_rep], axis=-1)  # (S, Bblk, Hp+128)
        den_lane = Hp

    # Inclusive prefix sum over time (axis 0, the outer dim): log-step
    # shift-add -> only leading-axis concat/slice + VPU adds (no masks,
    # no reshapes through the lane dim, no MXU).
    def cumsum_time(v):
        n = v.shape[0]
        d = 1
        while d < n:
            pad = jnp.zeros((d,) + v.shape[1:], v.dtype)
            v = v + jnp.concatenate([pad, v[:-d]], axis=0)
            d *= 2
        return v

    numden = cumsum_time(eh)                               # sum_{j<=i}
    den = numden[:, :, den_lane:den_lane + 1]              # (S, Bblk, 1)
    attn = numden[:, :, :Hp] * pl.reciprocal(den, approx=True)
    cum_prev = cumsum_time(attn) - attn                    # sum_{j<i} attn[j]

    # ---- fc + sigmoid (wfc split into top/bottom halves; no lane concat) ---
    # Junk in padded lanes (incl. the stash lane) hits zero rows of wfct -> 0.
    logits = (jnp.dot(cum_prev.reshape(S * Bblk, Hp).astype(bf16),
                      wfct_ref[...], preferred_element_type=f32)
              + jnp.dot(lo2, wfcb_ref[...], preferred_element_type=f32)
              + bfc_ref[...])
    out_ref[...] = jax.nn.sigmoid(logits).reshape(S, Bblk, Cp).astype(out_ref.dtype)


# --------------------------------------------------------------------------
# sizing helpers
# --------------------------------------------------------------------------
def _tpu_vmem_and_cores():
    """(physical VMEM bytes per TensorCore, has-2-TensorCores) best effort."""
    phys = None
    try:
        info = pltpu.get_tpu_info()
        for name in ("vmem_capacity_bytes", "vmem_size_bytes", "vmem_bytes"):
            v = getattr(info, name, None)
            if v:
                phys = int(v)
                break
    except Exception:
        phys = None
    kind = ""
    try:
        kind = jax.devices()[0].device_kind.lower()
    except Exception:
        pass
    two_core = ("v7" in kind) or ("7x" in kind)
    if phys is None:
        if two_core:
            phys = 64 * 1024 * 1024
        elif any(g in kind for g in ("v2", "v3", "v4", "v5", "v6")):
            phys = 128 * 1024 * 1024
        else:
            phys = 64 * 1024 * 1024           # conservative default
    return phys, two_core


def _block_vmem_bytes(S_pad, b, Din, Hp, Ap, Cp):
    """Rough per-block VMEM footprint (scratch + dbl-buffered IO + temps)."""
    scratch = S_pad * b * (4 * Hp + Hp) * 2                      # bf16 xw + h
    io = 2 * S_pad * b * Din * 2 + 2 * S_pad * b * Cp * 2        # bf16 in/out x2
    weights = 2 * 2 * (Din * 4 * Hp + Hp * 4 * Hp + Hp * Ap + Ap * 128
                       + 2 * Hp * Cp)
    live = S_pad * b * (4 * Hp + Ap + 128 + Cp) * 4              # f32 attn temps
    return scratch + io + weights + live


def _pick_b_blk(B, S_pad, Din, Hp, Ap, Cp, budget, two_core):
    Bpad0 = _round_up(B, 8)
    cands = sorted({8, 16, 32, 64, 128, 256, min(Bpad0, 256)}, reverse=True)
    pick = 8
    for b in cands:
        if b > Bpad0:
            continue
        if _block_vmem_bytes(S_pad, b, Din, Hp, Ap, Cp) <= budget:
            pick = b
            break
    # On 2-TC chips keep >=2 grid blocks so dimension_semantics=('parallel',)
    # can use both cores; shrink b_blk rather than running a 1-step grid.
    if two_core and Bpad0 >= 16:
        pick = min(pick, _round_up((Bpad0 + 1) // 2, 8))
    return pick


# --------------------------------------------------------------------------
# wrapper
# --------------------------------------------------------------------------
def atkt_forward_from_emb(interaction_emb, p, *, b_blk=None):
    """Pallas wrapper: predict_score = sigmoid(fc(attention(LSTM(emb))))."""
    B, S, Din = interaction_emb.shape
    H = p['whh'].shape[0]
    A = p['wmlp'].shape[1]
    C = p['wfc'].shape[1]
    f32, bf16 = jnp.float32, jnp.bfloat16

    Hp = _round_up(H, 128)       # lane-aligned hidden dim
    Ap = _round_up(A, 128)       # lane-dense attention dim
    Cp = _round_up(C, 128)       # lane-dense output dim
    S_pad = _round_up(S, 8)      # sublane-aligned time dim (free reshapes)
    UNROLL = 4                   # S_pad % 8 == 0 => divisible by 4

    phys_vmem, two_core = _tpu_vmem_and_cores()
    vmem_limit = int(phys_vmem * 0.82)          # ~105 MiB on 128 MiB parts, ~52 MiB on v7x
    if b_blk is None:
        b_blk = _pick_b_blk(B, S_pad, Din, Hp, Ap, Cp,
                            budget=int(phys_vmem * 0.70), two_core=two_core)
    Bpad = _round_up(max(B, b_blk), b_blk)

    # -- pad each LSTM gate into its own lane-aligned Hp block, reorder to
    #    (i, f, o, g) so sigmoid runs once over a contiguous 3*Hp slab --------
    gate_order = (0, 1, 3, 2)                   # src PyTorch order is (i,f,g,o)
    def pad_gates(wmat):                        # (rows, 4H) -> (rows, 4Hp)
        out = jnp.zeros((wmat.shape[0], 4 * Hp), f32)
        for dst, src in enumerate(gate_order):
            out = out.at[:, dst * Hp:dst * Hp + H].set(
                wmat[:, src * H:(src + 1) * H])
        return out

    wih_p = pad_gates(p['wih']).astype(bf16)                              # (Din,4Hp)
    whh_p = jnp.zeros((Hp, 4 * Hp), f32).at[:H].set(
        pad_gates(p['whh'])).astype(bf16)                                 # (Hp,4Hp)
    b_p = pad_gates(p['b_lstm'])                                          # (1,4Hp) f32
    wmlp_p = jnp.zeros((Hp, Ap), f32).at[:H, :A].set(p['wmlp']).astype(bf16)
    bmlp_p = jnp.zeros((1, Ap), f32).at[:, :A].set(p['bmlp'])
    wsim_rep = jnp.zeros((Ap, 128), f32).at[:A, :].set(
        jnp.broadcast_to(p['wsim'], (A, 128))).astype(bf16)               # replicated
    wfct_p = jnp.zeros((Hp, Cp), f32).at[:H, :C].set(p['wfc'][:H]).astype(bf16)
    wfcb_p = jnp.zeros((Hp, Cp), f32).at[:H, :C].set(p['wfc'][H:]).astype(bf16)
    bfc_p = jnp.zeros((1, Cp), f32).at[:, :C].set(p['bfc'])

    # time-major bf16 input, padded in time and batch
    x_tm = jnp.transpose(interaction_emb, (1, 0, 2)).astype(bf16)         # (S,B,Din)
    x_tm = jnp.pad(x_tm, ((0, S_pad - S), (0, Bpad - B), (0, 0)))

    def wspec(arr):
        return pl.BlockSpec(arr.shape, lambda b: (0, 0))

    grid_spec = pltpu.PrefetchScalarGridSpec(
        num_scalar_prefetch=0,
        grid=(Bpad // b_blk,),
        in_specs=[
            pl.BlockSpec((S_pad, b_blk, Din), lambda b: (0, b, 0)),
            wspec(wih_p), wspec(whh_p), wspec(b_p),
            wspec(wmlp_p), wspec(bmlp_p), wspec(wsim_rep),
            wspec(wfct_p), wspec(wfcb_p), wspec(bfc_p),
        ],
        out_specs=pl.BlockSpec((S_pad, b_blk, Cp), lambda b: (0, b, 0)),
        scratch_shapes=[pltpu.VMEM((S_pad, b_blk, 4 * Hp), bf16),   # x@Wih+b
                        pltpu.VMEM((S_pad, b_blk, Hp), bf16)],      # LSTM outputs
    )

    matmul_macs = (Din * 4 * Hp + Hp * 4 * Hp + Hp * Ap + Ap * 128 + 2 * Hp * Cp)
    cost = pl.CostEstimate(
        flops=2 * Bpad * S_pad * matmul_macs,
        transcendentals=Bpad * S_pad * (5 * Hp + Ap + 128 + Cp),
        bytes_accessed=int(x_tm.size * 2 + Bpad * S_pad * Cp * 2
                           + matmul_macs * 2),
    )

    out = pl.pallas_call(
        functools.partial(atkt_kernel, h_dim=H, unroll=UNROLL),
        out_shape=jax.ShapeDtypeStruct((S_pad, Bpad, Cp), bf16),
        grid_spec=grid_spec,
        compiler_params=pltpu.CompilerParams(
            dimension_semantics=("parallel",),
            vmem_limit_bytes=vmem_limit),
        cost_estimate=cost,
    )(x_tm, wih_p, whh_p, b_p, wmlp_p, bmlp_p, wsim_rep, wfct_p, wfcb_p, bfc_p)

    out = jnp.transpose(out, (1, 0, 2)).astype(f32)
    return out[:B, :S, :C]


# --------------------------------------------------------------------------
# plain-JAX glue + reference
# --------------------------------------------------------------------------
def get_interaction_emb(concept_seq, correct_seq, embed_concept, embed_correct):
    """Plain-JAX glue mirroring ATKT.get_interaction_emb."""
    concept_emb = embed_concept[concept_seq]                     # (B,S,dc)
    correct_emb = embed_correct[correct_seq]                     # (B,S,dr)
    concept_correct = jnp.concatenate([concept_emb, correct_emb], axis=2)
    correct_concept = jnp.concatenate([correct_emb, concept_emb], axis=2)
    return jnp.where(correct_seq[:, :, None] == 1,
                     concept_correct, correct_concept)


def atkt_forward_ref(x, p):
    """Pure-JAX f32 reference (matches PyTorch forward_from_emb semantics)."""
    B, S, _ = x.shape
    H = p['whh'].shape[0]

    def step(carry, xt):
        h, c = carry
        gates = xt @ p['wih'] + h @ p['whh'] + p['b_lstm']
        i = jax.nn.sigmoid(gates[:, 0 * H:1 * H])
        f = jax.nn.sigmoid(gates[:, 1 * H:2 * H])
        g = jnp.tanh(gates[:, 2 * H:3 * H])
        o = jax.nn.sigmoid(gates[:, 3 * H:4 * H])
        c2 = f * c + i * g
        h2 = o * jnp.tanh(c2)
        return (h2, c2), h2

    init = (jnp.zeros((B, H), jnp.float32), jnp.zeros((B, H), jnp.float32))
    _, hs = jax.lax.scan(step, init, jnp.swapaxes(x, 0, 1))
    lstm_out = jnp.swapaxes(hs, 0, 1)                            # (B,S,H)

    att = jnp.tanh(lstm_out @ p['wmlp'] + p['bmlp'])
    w = att @ p['wsim']                                          # (B,S,1)
    mask = jnp.triu(jnp.ones((S, S), bool), k=1)
    att_w = jnp.broadcast_to(jnp.swapaxes(w, 1, 2), (B, S, S))
    att_w = jnp.where(mask[None], -jnp.inf, att_w)
    alphas = jax.nn.softmax(att_w, axis=-1)
    attn = jnp.einsum('bij,bjd->bid', alphas, lstm_out)
    cum_prev = jnp.cumsum(attn, axis=1) - attn
    final = jnp.concatenate([cum_prev, lstm_out], axis=-1)
    return jax.nn.sigmoid(final @ p['wfc'] + p['bfc'])


if __name__ == "__main__":
    # Small, forward-consistent shapes.
    B, S = 2, 8
    num_concept = 16
    dim_concept = 8
    dim_correct = 8
    dim_latent = 32
    dim_attention = 16
    Din = dim_concept + dim_correct

    key = jax.random.PRNGKey(0)
    ks = jax.random.split(key, 12)

    # Embedding tables (nn.Embedding ~ N(0,1)), last row zeroed as in __init__.
    embed_concept = jax.random.normal(ks[0], (num_concept, dim_concept),
                                      jnp.float32).at[-1].set(0.0)
    embed_correct = jax.random.normal(ks[1], (2, dim_correct),
                                      jnp.float32).at[-1].set(0.0)

    u = lambda k, shape, s: jax.random.uniform(k, shape, jnp.float32, -s, s)
    sH = 1.0 / np.sqrt(dim_latent)
    params = {
        'wih':    u(ks[2], (Din, 4 * dim_latent), sH),
        'whh':    u(ks[3], (dim_latent, 4 * dim_latent), sH),
        'b_lstm': u(ks[4], (1, 4 * dim_latent), sH),          # b_ih + b_hh
        'wmlp':   u(ks[5], (dim_latent, dim_attention), sH),
        'bmlp':   u(ks[6], (1, dim_attention), sH),
        'wsim':   u(ks[7], (dim_attention, 1), 1.0 / np.sqrt(dim_attention)),
        'wfc':    u(ks[8], (2 * dim_latent, num_concept),
                    1.0 / np.sqrt(2 * dim_latent)),
        'bfc':    u(ks[9], (1, num_concept), 1.0 / np.sqrt(2 * dim_latent)),
    }

    concept_seq = jax.random.randint(ks[10], (B, S), 0, num_concept)
    correct_seq = jax.random.randint(ks[11], (B, S), 0, 2)

    interaction_emb = get_interaction_emb(concept_seq, correct_seq,
                                          embed_concept, embed_correct)

    predict_score = atkt_forward_from_emb(interaction_emb, params)
    predict_score = jax.block_until_ready(predict_score)

    # Sanity check against the pure-JAX f32 reference (kernel uses bf16 data
    # paths and an approx reciprocal -> loose tolerance).
    # TODO(synk): dropout / adversarial-training paths (get_predict_loss) are
    # training-only and not implemented; kernel covers eval-mode forward.
    ref = jax.block_until_ready(atkt_forward_ref(interaction_emb, params))
    np.testing.assert_allclose(np.asarray(predict_score), np.asarray(ref),
                               rtol=2e-2, atol=2e-2)

    assert predict_score.shape == (B, S, num_concept)
    print("KERNEL_OK")
</pallas_src>

<mosaic_0001>
module attributes {stable_mosaic.version = 11 : i64} {
  func.func @atkt_kernel(%arg0: i32, %arg1: memref<8x8x16xbf16, #tpu.memory_space<vmem>>, %arg2: memref<16x512xbf16, #tpu.memory_space<vmem>>, %arg3: memref<128x512xbf16, #tpu.memory_space<vmem>>, %arg4: memref<1x512xf32, #tpu.memory_space<vmem>>, %arg5: memref<128x128xbf16, #tpu.memory_space<vmem>>, %arg6: memref<1x128xf32, #tpu.memory_space<vmem>>, %arg7: memref<128x128xbf16, #tpu.memory_space<vmem>>, %arg8: memref<128x128xbf16, #tpu.memory_space<vmem>>, %arg9: memref<128x128xbf16, #tpu.memory_space<vmem>>, %arg10: memref<1x128xf32, #tpu.memory_space<vmem>>, %arg11: memref<8x8x128xbf16, #tpu.memory_space<vmem>>, %arg12: memref<8x8x512xbf16, #tpu.memory_space<vmem>>, %arg13: memref<8x8x128xbf16, #tpu.memory_space<vmem>>) attributes {dimension_semantics = [#tpu.dimension_semantics<parallel>], iteration_bounds = array<i64: 1>, scalar_prefetch = 0 : i64, scratch_operands = 2 : i64, tpu.core_type = #tpu.core_type<tc>, window_params = [{transform_indices = @transform_0, window_bounds = array<i64: 8, 8, 16>}, {pipeline_mode = #tpu.pipeline_mode<synchronous>, transform_indices = @transform_1, window_bounds = array<i64: 16, 512>}, {pipeline_mode = #tpu.pipeline_mode<synchronous>, transform_indices = @transform_2, window_bounds = array<i64: 128, 512>}, {pipeline_mode = #tpu.pipeline_mode<synchronous>, transform_indices = @transform_3, window_bounds = array<i64: 1, 512>}, {pipeline_mode = #tpu.pipeline_mode<synchronous>, transform_indices = @transform_4, window_bounds = array<i64: 128, 128>}, {pipeline_mode = #tpu.pipeline_mode<synchronous>, transform_indices = @transform_5, window_bounds = array<i64: 1, 128>}, {pipeline_mode = #tpu.pipeline_mode<synchronous>, transform_indices = @transform_6, window_bounds = array<i64: 128, 128>}, {pipeline_mode = #tpu.pipeline_mode<synchronous>, transform_indices = @transform_7, window_bounds = array<i64: 128, 128>}, {pipeline_mode = #tpu.pipeline_mode<synchronous>, transform_indices = @transform_8, window_bounds = array<i64: 128, 128>}, {pipeline_mode = #tpu.pipeline_mode<synchronous>, transform_indices = @transform_9, window_bounds = array<i64: 1, 128>}, {transform_indices = @transform_10, window_bounds = array<i64: 8, 8, 128>}]} {
    %c0 = arith.constant 0 : index
    %c0_0 = arith.constant 0 : index
    %c0_1 = arith.constant 0 : index
    %0 = vector.load %arg1[%c0, %c0_0, %c0_1] : memref<8x8x16xbf16, #tpu.memory_space<vmem>>, vector<8x8x16xbf16>
    %1 = vector.shape_cast %0 : vector<8x8x16xbf16> to vector<64x16xbf16>
    %c0_2 = arith.constant 0 : index
    %c0_3 = arith.constant 0 : index
    %2 = vector.load %arg2[%c0_2, %c0_3] : memref<16x512xbf16, #tpu.memory_space<vmem>>, vector<16x512xbf16>
    %cst = arith.constant dense<0.000000e+00> : vector<64x512xf32>
    %3 = tpu.matmul %1, %2, %cst {dimension_numbers = #tpu.dot_dimension_numbers<[1], [0], [0], [1], [0, 0, 1, 1], [], []>} : vector<64x16xbf16>, vector<16x512xbf16>, vector<64x512xf32> -> vector<64x512xf32>
    %c0_4 = arith.constant 0 : index
    %c0_5 = arith.constant 0 : index
    %4 = vector.load %arg4[%c0_4, %c0_5] : memref<1x512xf32, #tpu.memory_space<vmem>>, vector<1x512xf32>
    %5 = vector.broadcast %4 : vector<1x512xf32> to vector<64x512xf32>
    %6 = arith.addf %3, %5 : vector<64x512xf32>
    %7 = vector.shape_cast %6 : vector<64x512xf32> to vector<8x8x512xf32>
    %8 = arith.truncf %7 : vector<8x8x512xf32> to vector<8x8x512xbf16>
    %c0_6 = arith.constant 0 : index
    %c0_7 = arith.constant 0 : index
    %c0_8 = arith.constant 0 : index
    %9 = vector.load %arg12[%c0_6, %c0_7, %c0_8] : memref<8x8x512xbf16, #tpu.memory_space<vmem>>, vector<8x8x512xbf16>
    tpu.vector_store %arg12[%c0_6, %c0_7, %c0_8], %8 {strides = array<i32>} : memref<8x8x512xbf16, #tpu.memory_space<vmem>>, vector<8x8x512xbf16>,
    %c0_9 = arith.constant 0 : index
    %c0_10 = arith.constant 0 : index
    %10 = vector.load %arg3[%c0_9, %c0_10] : memref<128x512xbf16, #tpu.memory_space<vmem>>, vector<128x512xbf16>
    %cst_11 = arith.constant 0.000000e+00 : f32
    %11 = vector.broadcast %cst_11 : f32 to vector<8x128xf32>
    %c0_i32 = arith.constant 0 : i32
    %c2_i32 = arith.constant 2 : i32
    %12 = arith.addi %c0_i32, %c2_i32 : i32
    %c1_i32 = arith.constant 1 : i32
    %13:2 = scf.for %arg14 = %c0_i32 to %12 step %c1_i32 iter_args(%arg15 = %11, %arg16 = %11) -> (vector<8x128xf32>, vector<8x128xf32>)  : i32 {
      %c4_i32 = arith.constant 4 : i32
      %90 = arith.muli %arg14, %c4_i32 : i32
      %c0_i32_46 = arith.constant 0 : i32
      %91 = arith.addi %90, %c0_i32_46 : i32
      %92 = arith.index_cast %91 : i32 to index
      %c0_47 = arith.constant 0 : index
      %c0_48 = arith.constant 0 : index
      %93 = vector.load %arg12[%92, %c0_47, %c0_48] : memref<8x8x512xbf16, #tpu.memory_space<vmem>>, vector<1x8x512xbf16>
      %94 = vector.shape_cast %93 : vector<1x8x512xbf16> to vector<8x512xbf16>
      %95 = arith.truncf %arg15 : vector<8x128xf32> to vector<8x128xbf16>
      %cst_49 = arith.constant dense<0.000000e+00> : vector<8x512xf32>
      %96 = tpu.matmul %95, %10, %cst_49 {dimension_numbers = #tpu.dot_dimension_numbers<[1], [0], [0], [1], [0, 0, 1, 1], [], []>} : vector<8x128xbf16>, vector<128x512xbf16>, vector<8x512xf32> -> vector<8x512xf32>
      %97 = arith.extf %94 : vector<8x512xbf16> to vector<8x512xf32>
      %98 = arith.addf %97, %96 : vector<8x512xf32>
      %99 = vector.extract_strided_slice %98 {offsets = [0, 0], sizes = [8, 384], strides = [1, 1]} : vector<8x512xf32> to vector<8x384xf32>
      %100 = arith.negf %99 : vector<8x384xf32>
      %101 = math.exp %100 : vector<8x384xf32>
      %cst_50 = arith.constant 1.000000e+00 : f32
      %102 = vector.broadcast %cst_50 : f32 to vector<8x384xf32>
      %103 = arith.addf %102, %101 : vector<8x384xf32>
      %104 = arith.divf %102, %103 : vector<8x384xf32>
      %105 = vector.extract_strided_slice %104 {offsets = [0, 0], sizes = [8, 128], strides = [1, 1]} : vector<8x384xf32> to vector<8x128xf32>
      %106 = vector.extract_strided_slice %104 {offsets = [0, 128], sizes = [8, 128], strides = [1, 1]} : vector<8x384xf32> to vector<8x128xf32>
      %107 = vector.extract_strided_slice %104 {offsets = [0, 256], sizes = [8, 128], strides = [1, 1]} : vector<8x384xf32> to vector<8x128xf32>
      %108 = vector.extract_strided_slice %98 {offsets = [0, 384], sizes = [8, 128], strides = [1, 1]} : vector<8x512xf32> to vector<8x128xf32>
      %109 = math.tanh %108 : vector<8x128xf32>
      %110 = arith.mulf %106, %arg16 : vector<8x128xf32>
      %111 = arith.mulf %105, %109 : vector<8x128xf32>
      %112 = arith.addf %110, %111 : vector<8x128xf32>
      %113 = math.tanh %112 : vector<8x128xf32>
      %114 = arith.mulf %107, %113 : vector<8x128xf32>
      %115 = arith.truncf %114 : vector<8x128xf32> to vector<8x128xbf16>
      %116 = arith.index_cast %91 : i32 to index
      %c0_51 = arith.constant 0 : index
      %c0_52 = arith.constant 0 : index
      %117 = vector.load %arg13[%116, %c0_51, %c0_52] : memref<8x8x128xbf16, #tpu.memory_space<vmem>>, vector<1x8x128xbf16>
      %118 = vector.shape_cast %117 : vector<1x8x128xbf16> to vector<8x128xbf16>
      %119 = vector.shape_cast %115 : vector<8x128xbf16> to vector<1x8x128xbf16>
      tpu.vector_store %arg13[%116, %c0_51, %c0_52], %119 {strides = array<i32>} : memref<8x8x128xbf16, #tpu.memory_space<vmem>>, vector<1x8x128xbf16>,
      %c1_i32_53 = arith.constant 1 : i32
      %120 = arith.addi %90, %c1_i32_53 : i32
      %121 = arith.index_cast %120 : i32 to index
      %c0_54 = arith.constant 0 : index
      %c0_55 = arith.constant 0 : index
      %122 = vector.load %arg12[%121, %c0_54, %c0_55] : memref<8x8x512xbf16, #tpu.memory_space<vmem>>, vector<1x8x512xbf16>
      %123 = vector.shape_cast %122 : vector<1x8x512xbf16> to vector<8x512xbf16>
      %124 = arith.truncf %114 : vector<8x128xf32> to vector<8x128xbf16>
      %cst_56 = arith.constant dense<0.000000e+00> : vector<8x512xf32>
      %125 = tpu.matmul %124, %10, %cst_56 {dimension_numbers = #tpu.dot_dimension_numbers<[1], [0], [0], [1], [0, 0, 1, 1], [], []>} : vector<8x128xbf16>, vector<128x512xbf16>, vector<8x512xf32> -> vector<8x512xf32>
      %126 = arith.extf %123 : vector<8x512xbf16> to vector<8x512xf32>
      %127 = arith.addf %126, %125 : vector<8x512xf32>
      %128 = vector.extract_strided_slice %127 {offsets = [0, 0], sizes = [8, 384], strides = [1, 1]} : vector<8x512xf32> to vector<8x384xf32>
      %129 = arith.negf %128 : vector<8x384xf32>
      %130 = math.exp %129 : vector<8x384xf32>
      %cst_57 = arith.constant 1.000000e+00 : f32
      %131 = vector.broadcast %cst_57 : f32 to vector<8x384xf32>
      %132 = arith.addf %131, %130 : vector<8x384xf32>
      %133 = arith.divf %131, %132 : vector<8x384xf32>
      %134 = vector.extract_strided_slice %133 {offsets = [0, 0], sizes = [8, 128], strides = [1, 1]} : vector<8x384xf32> to vector<8x128xf32>
      %135 = vector.extract_strided_slice %133 {offsets = [0, 128], sizes = [8, 128], strides = [1, 1]} : vector<8x384xf32> to vector<8x128xf32>
      %136 = vector.extract_strided_slice %133 {offsets = [0, 256], sizes = [8, 128], strides = [1, 1]} : vector<8x384xf32> to vector<8x128xf32>
      %137 = vector.extract_strided_slice %127 {offsets = [0, 384], sizes = [8, 128], strides = [1, 1]} : vector<8x512xf32> to vector<8x128xf32>
      %138 = math.tanh %137 : vector<8x128xf32>
      %139 = arith.mulf %135, %112 : vector<8x128xf32>
      %140 = arith.mulf %134, %138 : vector<8x128xf32>
      %141 = arith.addf %139, %140 : vector<8x128xf32>
      %142 = math.tanh %141 : vector<8x128xf32>
      %143 = arith.mulf %136, %142 : vector<8x128xf32>
      %144 = arith.truncf %143 : vector<8x128xf32> to vector<8x128xbf16>
      %145 = arith.index_cast %120 : i32 to index
      %c0_58 = arith.constant 0 : index
      %c0_59 = arith.constant 0 : index
      %146 = vector.load %arg13[%145, %c0_58, %c0_59] : memref<8x8x128xbf16, #tpu.memory_space<vmem>>, vector<1x8x128xbf16>
      %147 = vector.shape_cast %146 : vector<1x8x128xbf16> to vector<8x128xbf16>
      %148 = vector.shape_cast %144 : vector<8x128xbf16> to vector<1x8x128xbf16>
      tpu.vector_store %arg13[%145, %c0_58, %c0_59], %148 {strides = array<i32>} : memref<8x8x128xbf16, #tpu.memory_space<vmem>>, vector<1x8x128xbf16>,
      %c2_i32_60 = arith.constant 2 : i32
      %149 = arith.addi %90, %c2_i32_60 : i32
      %150 = arith.index_cast %149 : i32 to index
      %c0_61 = arith.constant 0 : index
      %c0_62 = arith.constant 0 : index
      %151 = vector.load %arg12[%150, %c0_61, %c0_62] : memref<8x8x512xbf16, #tpu.memory_space<vmem>>, vector<1x8x512xbf16>
      %152 = vector.shape_cast %151 : vector<1x8x512xbf16> to vector<8x512xbf16>
      %153 = arith.truncf %143 : vector<8x128xf32> to vector<8x128xbf16>
      %cst_63 = arith.constant dense<0.000000e+00> : vector<8x512xf32>
      %154 = tpu.matmul %153, %10, %cst_63 {dimension_numbers = #tpu.dot_dimension_numbers<[1], [0], [0], [1], [0, 0, 1, 1], [], []>} : vector<8x128xbf16>, vector<128x512xbf16>, vector<8x512xf32> -> vector<8x512xf32>
      %155 = arith.extf %152 : vector<8x512xbf16> to vector<8x512xf32>
      %156 = arith.addf %155, %154 : vector<8x512xf32>
      %157 = vector.extract_strided_slice %156 {offsets = [0, 0], sizes = [8, 384], strides = [1, 1]} : vector<8x512xf32> to vector<8x384xf32>
      %158 = arith.negf %157 : vector<8x384xf32>
      %159 = math.exp %158 : vector<8x384xf32>
      %cst_64 = arith.constant 1.000000e+00 : f32
      %160 = vector.broadcast %cst_64 : f32 to vector<8x384xf32>
      %161 = arith.addf %160, %159 : vector<8x384xf32>
      %162 = arith.divf %160, %161 : vector<8x384xf32>
      %163 = vector.extract_strided_slice %162 {offsets = [0, 0], sizes = [8, 128], strides = [1, 1]} : vector<8x384xf32> to vector<8x128xf32>
      %164 = vector.extract_strided_slice %162 {offsets = [0, 128], sizes = [8, 128], strides = [1, 1]} : vector<8x384xf32> to vector<8x128xf32>
      %165 = vector.extract_strided_slice %162 {offsets = [0, 256], sizes = [8, 128], strides = [1, 1]} : vector<8x384xf32> to vector<8x128xf32>
      %166 = vector.extract_strided_slice %156 {offsets = [0, 384], sizes = [8, 128], strides = [1, 1]} : vector<8x512xf32> to vector<8x128xf32>
      %167 = math.tanh %166 : vector<8x128xf32>
      %168 = arith.mulf %164, %141 : vector<8x128xf32>
      %169 = arith.mulf %163, %167 : vector<8x128xf32>
      %170 = arith.addf %168, %169 : vector<8x128xf32>
      %171 = math.tanh %170 : vector<8x128xf32>
      %172 = arith.mulf %165, %171 : vector<8x128xf32>
      %173 = arith.truncf %172 : vector<8x128xf32> to vector<8x128xbf16>
      %174 = arith.index_cast %149 : i32 to index
      %c0_65 = arith.constant 0 : index
      %c0_66 = arith.constant 0 : index
      %175 = vector.load %arg13[%174, %c0_65, %c0_66] : memref<8x8x128xbf16, #tpu.memory_space<vmem>>, vector<1x8x128xbf16>
      %176 = vector.shape_cast %175 : vector<1x8x128xbf16> to vector<8x128xbf16>
      %177 = vector.shape_cast %173 : vector<8x128xbf16> to vector<1x8x128xbf16>
      tpu.vector_store %arg13[%174, %c0_65, %c0_66], %177 {strides = array<i32>} : memref<8x8x128xbf16, #tpu.memory_space<vmem>>, vector<1x8x128xbf16>,
      %c3_i32 = arith.constant 3 : i32
      %178 = arith.addi %90, %c3_i32 : i32
      %179 = arith.index_cast %178 : i32 to index
      %c0_67 = arith.constant 0 : index
      %c0_68 = arith.constant 0 : index
      %180 = vector.load %arg12[%179, %c0_67, %c0_68] : memref<8x8x512xbf16, #tpu.memory_space<vmem>>, vector<1x8x512xbf16>
      %181 = vector.shape_cast %180 : vector<1x8x512xbf16> to vector<8x512xbf16>
      %182 = arith.truncf %172 : vector<8x128xf32> to vector<8x128xbf16>
      %cst_69 = arith.constant dense<0.000000e+00> : vector<8x512xf32>
      %183 = tpu.matmul %182, %10, %cst_69 {dimension_numbers = #tpu.dot_dimension_numbers<[1], [0], [0], [1], [0, 0, 1, 1], [], []>} : vector<8x128xbf16>, vector<128x512xbf16>, vector<8x512xf32> -> vector<8x512xf32>
      %184 = arith.extf %181 : vector<8x512xbf16> to vector<8x512xf32>
      %185 = arith.addf %184, %183 : vector<8x512xf32>
      %186 = vector.extract_strided_slice %185 {offsets = [0, 0], sizes = [8, 384], strides = [1, 1]} : vector<8x512xf32> to vector<8x384xf32>
      %187 = arith.negf %186 : vector<8x384xf32>
      %188 = math.exp %187 : vector<8x384xf32>
      %cst_70 = arith.constant 1.000000e+00 : f32
      %189 = vector.broadcast %cst_70 : f32 to vector<8x384xf32>
      %190 = arith.addf %189, %188 : vector<8x384xf32>
      %191 = arith.divf %189, %190 : vector<8x384xf32>
      %192 = vector.extract_strided_slice %191 {offsets = [0, 0], sizes = [8, 128], strides = [1, 1]} : vector<8x384xf32> to vector<8x128xf32>
      %193 = vector.extract_strided_slice %191 {offsets = [0, 128], sizes = [8, 128], strides = [1, 1]} : vector<8x384xf32> to vector<8x128xf32>
      %194 = vector.extract_strided_slice %191 {offsets = [0, 256], sizes = [8, 128], strides = [1, 1]} : vector<8x384xf32> to vector<8x128xf32>
      %195 = vector.extract_strided_slice %185 {offsets = [0, 384], sizes = [8, 128], strides = [1, 1]} : vector<8x512xf32> to vector<8x128xf32>
      %196 = math.tanh %195 : vector<8x128xf32>
      %197 = arith.mulf %193, %170 : vector<8x128xf32>
      %198 = arith.mulf %192, %196 : vector<8x128xf32>
      %199 = arith.addf %197, %198 : vector<8x128xf32>
      %200 = math.tanh %199 : vector<8x128xf32>
      %201 = arith.mulf %194, %200 : vector<8x128xf32>
      %202 = arith.truncf %201 : vector<8x128xf32> to vector<8x128xbf16>
      %203 = arith.index_cast %178 : i32 to index
      %c0_71 = arith.constant 0 : index
      %c0_72 = arith.constant 0 : index
      %204 = vector.load %arg13[%203, %c0_71, %c0_72] : memref<8x8x128xbf16, #tpu.memory_space<vmem>>, vector<1x8x128xbf16>
      %205 = vector.shape_cast %204 : vector<1x8x128xbf16> to vector<8x128xbf16>
      %206 = vector.shape_cast %202 : vector<8x128xbf16> to vector<1x8x128xbf16>
      tpu.vector_store %arg13[%203, %c0_71, %c0_72], %206 {strides = array<i32>} : memref<8x8x128xbf16, #tpu.memory_space<vmem>>, vector<1x8x128xbf16>,
      scf.yield %201, %199 : vector<8x128xf32>, vector<8x128xf32>
    }
    %c2_i32_12 = arith.constant 2 : i32
    %c0_13 = arith.constant 0 : index
    %c0_14 = arith.constant 0 : index
    %c0_15 = arith.constant 0 : index
    %14 = vector.load %arg13[%c0_13, %c0_14, %c0_15] : memref<8x8x128xbf16, #tpu.memory_space<vmem>>, vector<8x8x128xbf16>
    %15 = vector.shape_cast %14 : vector<8x8x128xbf16> to vector<64x128xbf16>
    %c0_16 = arith.constant 0 : index
    %c0_17 = arith.constant 0 : index
    %16 = vector.load %arg5[%c0_16, %c0_17] : memref<128x128xbf16, #tpu.memory_space<vmem>>, vector<128x128xbf16>
    %cst_18 = arith.constant dense<0.000000e+00> : vector<64x128xf32>
    %17 = tpu.matmul %15, %16, %cst_18 {dimension_numbers = #tpu.dot_dimension_numbers<[1], [0], [0], [1], [0, 0, 1, 1], [], []>} : vector<64x128xbf16>, vector<128x128xbf16>, vector<64x128xf32> -> vector<64x128xf32>
    %c0_19 = arith.constant 0 : index
    %c0_20 = arith.constant 0 : index
    %18 = vector.load %arg6[%c0_19, %c0_20] : memref<1x128xf32, #tpu.memory_space<vmem>>, vector<1x128xf32>
    %19 = vector.broadcast %18 : vector<1x128xf32> to vector<64x128xf32>
    %20 = arith.addf %17, %19 : vector<64x128xf32>
    %21 = math.tanh %20 : vector<64x128xf32>
    %22 = arith.truncf %21 : vector<64x128xf32> to vector<64x128xbf16>
    %c0_21 = arith.constant 0 : index
    %c0_22 = arith.constant 0 : index
    %23 = vector.load %arg7[%c0_21, %c0_22] : memref<128x128xbf16, #tpu.memory_space<vmem>>, vector<128x128xbf16>
    %cst_23 = arith.constant dense<0.000000e+00> : vector<64x128xf32>
    %24 = tpu.matmul %22, %23, %cst_23 {dimension_numbers = #tpu.dot_dimension_numbers<[1], [0], [0], [1], [0, 0, 1, 1], [], []>} : vector<64x128xbf16>, vector<128x128xbf16>, vector<64x128xf32> -> vector<64x128xf32>
    %25 = vector.shape_cast %24 : vector<64x128xf32> to vector<1x64x128xf32>
    %cst_24 = arith.constant dense<0xFF800000> : vector<1xf32>
    %26 = vector.multi_reduction <maximumf>, %25, %cst_24 [1, 2] : vector<1x64x128xf32> to vector<1xf32>
    %27 = vector.shape_cast %26 : vector<1xf32> to vector<1x1x1xf32>
    %28 = vector.extract %27[0, 0, 0] : f32 from vector<1x1x1xf32>
    %29 = vector.broadcast %28 : f32 to vector<64x128xf32>
    %30 = arith.subf %24, %29 : vector<64x128xf32>
    %31 = math.exp %30 : vector<64x128xf32>
    %32 = vector.shape_cast %31 : vector<64x128xf32> to vector<8x8x128xf32>
    %c0_25 = arith.constant 0 : index
    %c0_26 = arith.constant 0 : index
    %c0_27 = arith.constant 0 : index
    %33 = vector.load %arg13[%c0_25, %c0_26, %c0_27] : memref<8x8x128xbf16, #tpu.memory_space<vmem>>, vector<8x8x128xbf16>
    %34 = tpu.iota {dimensions = array<i32: 2>} : vector<1x1x128xi32>
    %c32_i32 = arith.constant 32 : i32
    %35 = vector.broadcast %c32_i32 : i32 to vector<1x1x128xi32>
    %36 = arith.cmpi eq, %34, %35 : vector<1x1x128xi32>
    %37 = arith.extui %36 : vector<1x1x128xi1> to vector<1x1x128xi32>
    %38 = arith.sitofp %37 : vector<1x1x128xi32> to vector<1x1x128xf32>
    %39 = arith.extf %33 : vector<8x8x128xbf16> to vector<8x8x128xf32>
    %40 = vector.broadcast %38 : vector<1x1x128xf32> to vector<8x8x128xf32>
    %41 = arith.addf %39, %40 : vector<8x8x128xf32>
    %42 = arith.mulf %32, %41 : vector<8x8x128xf32>
    %cst_28 = arith.constant 0.000000e+00 : f32
    %43 = vector.broadcast %cst_28 : f32 to vector<1x8x128xf32>
    %44 = vector.extract_strided_slice %42 {offsets = [0, 0, 0], sizes = [7, 8, 128], strides = [1, 1, 1]} : vector<8x8x128xf32> to vector<7x8x128xf32>
    %45 = tpu.concatenate %43, %44 in 0 : vector<1x8x128xf32>, vector<7x8x128xf32> -> vector<8x8x128xf32>
    %46 = arith.addf %42, %45 : vector<8x8x128xf32>
    %cst_29 = arith.constant 0.000000e+00 : f32
    %47 = vector.broadcast %cst_29 : f32 to vector<2x8x128xf32>
    %48 = vector.extract_strided_slice %46 {offsets = [0, 0, 0], sizes = [6, 8, 128], strides = [1, 1, 1]} : vector<8x8x128xf32> to vector<6x8x128xf32>
    %49 = tpu.concatenate %47, %48 in 0 : vector<2x8x128xf32>, vector<6x8x128xf32> -> vector<8x8x128xf32>
    %50 = arith.addf %46, %49 : vector<8x8x128xf32>
    %cst_30 = arith.constant 0.000000e+00 : f32
    %51 = vector.broadcast %cst_30 : f32 to vector<4x8x128xf32>
    %52 = vector.extract_strided_slice %50 {offsets = [0, 0, 0], sizes = [4, 8, 128], strides = [1, 1, 1]} : vector<8x8x128xf32> to vector<4x8x128xf32>
    %53 = tpu.concatenate %51, %52 in 0 : vector<4x8x128xf32>, vector<4x8x128xf32> -> vector<8x8x128xf32>
    %54 = arith.addf %50, %53 : vector<8x8x128xf32>
    %55 = vector.extract_strided_slice %54 {offsets = [0, 0, 32], sizes = [8, 8, 1], strides = [1, 1, 1]} : vector<8x8x128xf32> to vector<8x8x1xf32>
    %56 = tpu.reciprocal %55 {approx = true} : vector<8x8x1xf32> -> vector<8x8x1xf32>
    %57 = vector.broadcast %56 : vector<8x8x1xf32> to vector<8x8x128xf32>
    %58 = arith.mulf %54, %57 : vector<8x8x128xf32>
    %cst_31 = arith.constant 0.000000e+00 : f32
    %59 = vector.broadcast %cst_31 : f32 to vector<1x8x128xf32>
    %60 = vector.extract_strided_slice %58 {offsets = [0, 0, 0], sizes = [7, 8, 128], strides = [1, 1, 1]} : vector<8x8x128xf32> to vector<7x8x128xf32>
    %61 = tpu.concatenate %59, %60 in 0 : vector<1x8x128xf32>, vector<7x8x128xf32> -> vector<8x8x128xf32>
    %62 = arith.addf %58, %61 : vector<8x8x128xf32>
    %cst_32 = arith.constant 0.000000e+00 : f32
    %63 = vector.broadcast %cst_32 : f32 to vector<2x8x128xf32>
    %64 = vector.extract_strided_slice %62 {offsets = [0, 0, 0], sizes = [6, 8, 128], strides = [1, 1, 1]} : vector<8x8x128xf32> to vector<6x8x128xf32>
    %65 = tpu.concatenate %63, %64 in 0 : vector<2x8x128xf32>, vector<6x8x128xf32> -> vector<8x8x128xf32>
    %66 = arith.addf %62, %65 : vector<8x8x128xf32>
    %cst_33 = arith.constant 0.000000e+00 : f32
    %67 = vector.broadcast %cst_33 : f32 to vector<4x8x128xf32>
    %68 = vector.extract_strided_slice %66 {offsets = [0, 0, 0], sizes = [4, 8, 128], strides = [1, 1, 1]} : vector<8x8x128xf32> to vector<4x8x128xf32>
    %69 = tpu.concatenate %67, %68 in 0 : vector<4x8x128xf32>, vector<4x8x128xf32> -> vector<8x8x128xf32>
    %70 = arith.addf %66, %69 : vector<8x8x128xf32>
    %71 = arith.subf %70, %58 : vector<8x8x128xf32>
    %72 = vector.shape_cast %71 : vector<8x8x128xf32> to vector<64x128xf32>
    %73 = arith.truncf %72 : vector<64x128xf32> to vector<64x128xbf16>
    %c0_34 = arith.constant 0 : index
    %c0_35 = arith.constant 0 : index
    %74 = vector.load %arg8[%c0_34, %c0_35] : memref<128x128xbf16, #tpu.memory_space<vmem>>, vector<128x128xbf16>
    %cst_36 = arith.constant dense<0.000000e+00> : vector<64x128xf32>
    %75 = tpu.matmul %73, %74, %cst_36 {dimension_numbers = #tpu.dot_dimension_numbers<[1], [0], [0], [1], [0, 0, 1, 1], [], []>} : vector<64x128xbf16>, vector<128x128xbf16>, vector<64x128xf32> -> vector<64x128xf32>
    %c0_37 = arith.constant 0 : index
    %c0_38 = arith.constant 0 : index
    %76 = vector.load %arg9[%c0_37, %c0_38] : memref<128x128xbf16, #tpu.memory_space<vmem>>, vector<128x128xbf16>
    %cst_39 = arith.constant dense<0.000000e+00> : vector<64x128xf32>
    %77 = tpu.matmul %15, %76, %cst_39 {dimension_numbers = #tpu.dot_dimension_numbers<[1], [0], [0], [1], [0, 0, 1, 1], [], []>} : vector<64x128xbf16>, vector<128x128xbf16>, vector<64x128xf32> -> vector<64x128xf32>
    %78 = arith.addf %75, %77 : vector<64x128xf32>
    %c0_40 = arith.constant 0 : index
    %c0_41 = arith.constant 0 : index
    %79 = vector.load %arg10[%c0_40, %c0_41] : memref<1x128xf32, #tpu.memory_space<vmem>>, vector<1x128xf32>
    %80 = vector.broadcast %79 : vector<1x128xf32> to vector<64x128xf32>
    %81 = arith.addf %78, %80 : vector<64x128xf32>
    %82 = arith.negf %81 : vector<64x128xf32>
    %83 = math.exp %82 : vector<64x128xf32>
    %cst_42 = arith.constant 1.000000e+00 : f32
    %84 = vector.broadcast %cst_42 : f32 to vector<64x128xf32>
    %85 = arith.addf %84, %83 : vector<64x128xf32>
    %86 = arith.divf %84, %85 : vector<64x128xf32>
    %87 = vector.shape_cast %86 : vector<64x128xf32> to vector<8x8x128xf32>
    %88 = arith.truncf %87 : vector<8x8x128xf32> to vector<8x8x128xbf16>
    %c0_43 = arith.constant 0 : index
    %c0_44 = arith.constant 0 : index
    %c0_45 = arith.constant 0 : index
    %89 = vector.load %arg11[%c0_43, %c0_44, %c0_45] : memref<8x8x128xbf16, #tpu.memory_space<vmem>>, vector<8x8x128xbf16>
    tpu.vector_store %arg11[%c0_43, %c0_44, %c0_45], %88 {strides = array<i32>} : memref<8x8x128xbf16, #tpu.memory_space<vmem>>, vector<8x8x128xbf16>,
    return
  }
  func.func @transform_0(%arg0: i32) -> (i32, i32, i32) {
    %c0_i32 = arith.constant 0 : i32
    %c0_i32_0 = arith.constant 0 : i32
    %c0_i32_1 = arith.constant 0 : i32
    return %c0_i32, %arg0, %c0_i32_0 : i32, i32, i32
  }
  func.func @transform_1(%arg0: i32) -> (i32, i32) {
    %c0_i32 = arith.constant 0 : i32
    %c0_i32_0 = arith.constant 0 : i32
    %c0_i32_1 = arith.constant 0 : i32
    return %c0_i32, %c0_i32_0 : i32, i32
  }
  func.func @transform_2(%arg0: i32) -> (i32, i32) {
    %c0_i32 = arith.constant 0 : i32
    %c0_i32_0 = arith.constant 0 : i32
    %c0_i32_1 = arith.constant 0 : i32
    return %c0_i32, %c0_i32_0 : i32, i32
  }
  func.func @transform_3(%arg0: i32) -> (i32, i32) {
    %c0_i32 = arith.constant 0 : i32
    %c0_i32_0 = arith.constant 0 : i32
    %c0_i32_1 = arith.constant 0 : i32
    return %c0_i32, %c0_i32_0 : i32, i32
  }
  func.func @transform_4(%arg0: i32) -> (i32, i32) {
    %c0_i32 = arith.constant 0 : i32
    %c0_i32_0 = arith.constant 0 : i32
    %c0_i32_1 = arith.constant 0 : i32
    return %c0_i32, %c0_i32_0 : i32, i32
  }
  func.func @transform_5(%arg0: i32) -> (i32, i32) {
    %c0_i32 = arith.constant 0 : i32
    %c0_i32_0 = arith.constant 0 : i32
    %c0_i32_1 = arith.constant 0 : i32
    return %c0_i32, %c0_i32_0 : i32, i32
  }
  func.func @transform_6(%arg0: i32) -> (i32, i32) {
    %c0_i32 = arith.constant 0 : i32
    %c0_i32_0 = arith.constant 0 : i32
    %c0_i32_1 = arith.constant 0 : i32
    return %c0_i32, %c0_i32_0 : i32, i32
  }
  func.func @transform_7(%arg0: i32) -> (i32, i32) {
    %c0_i32 = arith.constant 0 : i32
    %c0_i32_0 = arith.constant 0 : i32
    %c0_i32_1 = arith.constant 0 : i32
    return %c0_i32, %c0_i32_0 : i32, i32
  }
  func.func @transform_8(%arg0: i32) -> (i32, i32) {
    %c0_i32 = arith.constant 0 : i32
    %c0_i32_0 = arith.constant 0 : i32
    %c0_i32_1 = arith.constant 0 : i32
    return %c0_i32, %c0_i32_0 : i32, i32
  }
  func.func @transform_9(%arg0: i32) -> (i32, i32) {
    %c0_i32 = arith.constant 0 : i32
    %c0_i32_0 = arith.constant 0 : i32
    %c0_i32_1 = arith.constant 0 : i32
    return %c0_i32, %c0_i32_0 : i32, i32
  }
  func.func @transform_10(%arg0: i32) -> (i32, i32, i32) {
    %c0_i32 = arith.constant 0 : i32
    %c0_i32_0 = arith.constant 0 : i32
    %c0_i32_1 = arith.constant 0 : i32
    return %c0_i32, %arg0, %c0_i32_0 : i32, i32, i32
  }
}

</mosaic_0001>

<bundles_post_ra>
// kernel: tpu_custom_call.1
= control target key start
LH: loop header
LB: loop body
LE: loop exit
PB: predicated region body
PF: predicated region fallthrough
CT: control target
= control target key end

     0   :  { %15 = vsyncpa [#allocation5], 0  ;;  %s3489_s0 = inlined_call_operand.hbm [shape: bf16[8,8,16], index: 0, kind: input, shape index: {}]   ;;  %s3490_s1 = inlined_call_operand.hbm [shape: bf16[16,512], index: 1, kind: input, shape index: {}]   ;;  %s3491_s2 = inlined_call_operand.hbm [shape: bf16[128,512], index: 2, kind: input, shape index: {}]   ;;  %s3492_s3 = inlined_call_operand.vmem [shape: f32[1,512], index: 3, kind: input, shape index: {}]   ;;  %s3493_s4 = inlined_call_operand.hbm [shape: bf16[128,128], index: 4, kind: input, shape index: {}]   ;;  %s3494_s5 = inlined_call_operand.vmem [shape: f32[1,128], index: 5, kind: input, shape index: {}]   ;;  %s3495_s6 = inlined_call_operand.hbm [shape: bf16[128,128], index: 6, kind: input, shape index: {}]   ;;  %s3496_s7 = inlined_call_operand.hbm [shape: bf16[128,128], index: 7, kind: input, shape index: {}]   ;;  %s3497_s8 = inlined_call_operand.hbm [shape: bf16[128,128], index: 8, kind: input, shape index: {}]   ;;  %s3498_s9 = inlined_call_operand.vmem [shape: f32[1,128], index: 9, kind: input, shape index: {}]   ;;  %s3499_s10 = inlined_call_operand.hbm [shape: bf16[8,8,128], index: 10, kind: output, shape index: {}]  }
   0x1   :  { %16 = vsyncpa [#allocation8], 0 }
   0x2   :  { %17 = vsyncpa [#allocation11], 0 }
   0x3   :  { %18 = vsyncpa [#allocation14], 0 }
   0x4   :  { %19 = vsyncpa [#allocation6], 0  ;;  %s2869_s13 = smov [#allocation7]  }
   0x5   :  { %s37_s14 = sshll.u32 %s2869_s13, 4  ;;  %s38_s14 = int_to_ptr.vmem [resolvable:$true] %s37_s14 }
   0x6   :  { %s2683_s15 = scalar_lea.vmem %s38_s14, 512  ;;  %p2688_p1 = scmp.lt.s32.totalorder %s38_s14, %s38_s14 }
   0x7   :  { %p2684_p0 = scmp.ne.s32.totalorder %s38_s14, %s2683_s15  ;;  %p2689_p2 = scmp.lt.s32.totalorder %s2683_s15, %s2683_s15 }
   0x9   :  { %p2690_p3 = por %p2689_p2, %p2688_p1 }
   0xb   :  { %p2691_p4 = pnand %p2690_p3, %p2684_p0 }
   0xd   :  { %2694 = shalt.err (!%p2691_p4)
}
   0xe   :  { %s2870_s16 = smov 256   ;;  %s2871_s17 = smov 16  }
   0xf   :  { %43 = dma.hbm_to_vmem [thread:$0]  %s3490_s1, 512, %s38_s14, [#allocation8], %s2870_s16, %s2870_s16, %s2871_s17  }
  0x10   :  { %s2872_s20 = smov [#allocation10]   ;;  %s2873_s22 = smov [#allocation13]  }
  0x11   :  { %s63_s21 = sshll.u32 %s2872_s20, 4  ;;  %s89_s23 = sshll.u32 %s2873_s22, 4  ;;  %s64_s21 = int_to_ptr.vmem [resolvable:$true] %s63_s21  ;;  %s90_s23 = int_to_ptr.vmem [resolvable:$true] %s89_s23 }
  0x12   :  { %s2703_s24 = scalar_lea.vmem %s64_s21, 1024  ;;  %p2708_p6 = scmp.lt.s32.totalorder %s64_s21, %s64_s21 }
  0x13   :  { %p2704_p5 = scmp.ne.s32.totalorder %s64_s21, %s2703_s24  ;;  %p2709_p7 = scmp.lt.s32.totalorder %s2703_s24, %s2703_s24 }
  0x15   :  { %p2710_p8 = por %p2709_p7, %p2708_p6 }
  0x17   :  { %p2711_p9 = pnand %p2710_p8, %p2704_p5 }
  0x19   :  { %2714 = shalt.err (!%p2711_p9)
}
  0x1a   :  { %s2874_s25 = smov 64   ;;  %s2875_s26 = smov 4  }
  0x1b   :  { %69 = dma.hbm_to_vmem [thread:$0]  %s3493_s4, 1024, %s64_s21, [#allocation11], %s2874_s25, %s2874_s25, %s2875_s26  }
  0x1c   :  { %s2723_s1 = scalar_lea.vmem %s90_s23, 1024  ;;  %p2728_p11 = scmp.lt.s32.totalorder %s90_s23, %s90_s23 }
  0x1d   :  { %p2724_p10 = scmp.ne.s32.totalorder %s90_s23, %s2723_s1  ;;  %p2729_p12 = scmp.lt.s32.totalorder %s2723_s1, %s2723_s1 }
  0x1f   :  { %p2730_p13 = por %p2729_p12, %p2728_p11 }
  0x21   :  { %p2731_p0 = pnand %p2730_p13, %p2724_p10 }
  0x23   :  { %2734 = shalt.err (!%p2731_p0)
}
  0x24   :  { %95 = dma.hbm_to_vmem [thread:$0]  %s3496_s7, 1024, %s90_s23, [#allocation14], %s2874_s25, %s2874_s25, %s2875_s26  }
  0x25   :  { %s2876_s11 = smov [#allocation4]   ;;  %s2877_s13 = smov [#allocation9]  }
  0x26   :  { %s25_s12 = sshll.u32 %s2876_s11, 4  ;;  %s49_s4 = sshll.u32 %s2877_s13, 4  ;;  %s26_s12 = int_to_ptr.vmem [resolvable:$true] %s25_s12  ;;  %s50_s4 = int_to_ptr.vmem [resolvable:$true] %s49_s4 }
  0x27   :  { %s2743_s14 = scalar_lea.vmem %s26_s12, 512  ;;  %p2748_p2 = scmp.lt.s32.totalorder %s26_s12, %s26_s12 }
  0x28   :  { %p2744_p1 = scmp.ne.s32.totalorder %s26_s12, %s2743_s14  ;;  %p2749_p3 = scmp.lt.s32.totalorder %s2743_s14, %s2743_s14 }
  0x2a   :  { %p2750_p4 = por %p2749_p3, %p2748_p2 }
  0x2c   :  { %p2751_p5 = pnand %p2750_p4, %p2744_p1 }
  0x2e   :  { %2754 = shalt.err (!%p2751_p5)
}
  0x2f   :  { %31 = dma.hbm_to_vmem [thread:$0]  %s3489_s0, 512, %s26_s12, [#allocation5], %s2874_s25, %s2874_s25, %s2875_s26  }
  0x30   :  { %s2763_s7 = scalar_lea.vmem %s50_s4, 4096  ;;  %p2768_p7 = scmp.lt.s32.totalorder %s50_s4, %s50_s4 }
  0x31   :  { %p2764_p6 = scmp.ne.s32.totalorder %s50_s4, %s2763_s7  ;;  %p2769_p8 = scmp.lt.s32.totalorder %s2763_s7, %s2763_s7 }
  0x33   :  { %p2770_p9 = por %p2769_p8, %p2768_p7 }
  0x35   :  { %p2771_p10 = pnand %p2770_p9, %p2764_p6 }
  0x37   :  { %2774 = shalt.err (!%p2771_p10)
}
  0x38   :  { %55 = dma.hbm_to_vmem [thread:$0]  %s3491_s2, 4096, %s50_s4, [#allocation8], %s2870_s16, %s2870_s16, %s2871_s17  }
  0x39   :  { %s2878_s21 = smov [#allocation12]   ;;  %s2879_s23 = smov [#allocation15]  }
  0x3a   :  { %s77_s22 = sshll.u32 %s2878_s21, 4  ;;  %s101_s0 = sshll.u32 %s2879_s23, 4  ;;  %s78_s22 = int_to_ptr.vmem [resolvable:$true] %s77_s22  ;;  %s102_s0 = int_to_ptr.vmem [resolvable:$true] %s101_s0 }
  0x3b   :  { %s2783_s24 = scalar_lea.vmem %s78_s22, 1024  ;;  %p2788_p12 = scmp.lt.s32.totalorder %s78_s22, %s78_s22 }
  0x3c   :  { %p2784_p11 = scmp.ne.s32.totalorder %s78_s22, %s2783_s24  ;;  %p2789_p13 = scmp.lt.s32.totalorder %s2783_s24, %s2783_s24 }
  0x3e   :  { %p2790_p0 = por %p2789_p13, %p2788_p12 }
  0x40   :  { %p2791_p1 = pnand %p2790_p0, %p2784_p11 }
  0x42   :  { %2794 = shalt.err (!%p2791_p1)
}
  0x43   :  { %83 = dma.hbm_to_vmem [thread:$0]  %s3495_s6, 1024, %s78_s22, [#allocation11], %s2874_s25, %s2874_s25, %s2875_s26  }
  0x44   :  { %s2803_s2 = scalar_lea.vmem %s102_s0, 1024  ;;  %p2808_p3 = scmp.lt.s32.totalorder %s102_s0, %s102_s0 }
  0x45   :  { %p2804_p2 = scmp.ne.s32.totalorder %s102_s0, %s2803_s2  ;;  %p2809_p4 = scmp.lt.s32.totalorder %s2803_s2, %s2803_s2 }
  0x47   :  { %p2810_p5 = por %p2809_p4, %p2808_p3 }
  0x49   :  { %p2811_p6 = pnand %p2810_p5, %p2804_p2 }
  0x4b   :  { %2814 = shalt.err (!%p2811_p6)
}
  0x4c   :  { %107 = dma.hbm_to_vmem [thread:$0]  %s3497_s8, 1024, %s102_s0, [#allocation14], %s2874_s25, %s2874_s25, %s2875_s26  }
  0x4d   :  { %2847 = dma.done.wait [#allocation5], 512  }
  0x4e   :  { %2848 = vsyncadd [#allocation5], 4294966784 }
  0x4f   :  { %2849 = dma.done.wait [#allocation8], 4608  }
  0x50   :  { %2850 = vsyncadd [#allocation8], 4294962688 }
  0x51   :  { %2851 = dma.done.wait [#allocation11], 2048  }
  0x52   :  { %2852 = vsyncadd [#allocation11], 4294965248 }
  0x53   :  { %2853 = dma.done.wait [#allocation14], 2048  }
  0x54   :  { %2854 = vsyncadd [#allocation14], 4294965248  ;;  %v2880_v0 = vmov 0   ;;  %v2982_v1 = vld [vmem:[#allocation9] sm:$0xff]  ;;  %v2984_v2 = vld [vmem:[#allocation9 + $0x8] sm:$0xff]  ;;  %vm206_vm0 = vcmask 130048   ;;  %v3500_v41 = vlaneseq }
  0x55   :  { %251 = vmatprep.mubr.bf16.mxu0 %v2880_v0  ;;  %324 = vmatprep.mubr.bf16.mxu1 %v2880_v0  ;;  %3526 = vst [vmem:[#allocation22_spill] sm:$0xff] %v2982_v1  ;;  %3527 = vst [vmem:[#allocation23_spill] sm:$0xff] %v2984_v2  ;;  %v2986_v3 = vld [vmem:[#allocation9 + $0x10] sm:$0xff]  ;;  %v2988_v4 = vld [vmem:[#allocation9 + $0x18] sm:$0xff] }
  0x56   :  { %3528 = vst [vmem:[#allocation24_spill] sm:$0xff] %v2986_v3  ;;  %3529 = vst [vmem:[#allocation25_spill] sm:$0xff] %v2988_v4  ;;  %v2990_v5 = vld [vmem:[#allocation9 + $0x20] sm:$0xff]  ;;  %v2992_v6 = vld [vmem:[#allocation9 + $0x28] sm:$0xff]  ;;  %v147_v42 = vshrl.u32 %v3500_v41, 7 }
  0x57   :  { %3530 = vst [vmem:[#allocation26_spill] sm:$0xff] %v2990_v5  ;;  %3531 = vst [vmem:[#allocation27_spill] sm:$0xff] %v2992_v6  ;;  %v2994_v7 = vld [vmem:[#allocation9 + $0x30] sm:$0xff]  ;;  %v2996_v8 = vld [vmem:[#allocation9 + $0x38] sm:$0xff] }
  0x58   :  { %3532 = vst [vmem:[#allocation28_spill] sm:$0xff] %v2994_v7  ;;  %3533 = vst [vmem:[#allocation29_spill] sm:$0xff] %v2996_v8  ;;  %v2998_v9 = vld [vmem:[#allocation9 + $0x40] sm:$0xff]  ;;  %v3000_v10 = vld [vmem:[#allocation9 + $0x48] sm:$0xff]  ;;  %v148_v43 = vsub.s32 0, %v147_v42  ;;  %v152_v44 = vsub.s32 1, %v147_v42 }
  0x59   :  { %3534 = vst [vmem:[#allocation30_spill] sm:$0xff] %v2998_v9  ;;  %3535 = vst [vmem:[#allocation31_spill] sm:$0xff] %v3000_v10  ;;  %v3002_v11 = vld [vmem:[#allocation9 + $0x50] sm:$0xff]  ;;  %v3004_v12 = vld [vmem:[#allocation9 + $0x58] sm:$0xff]  ;;  %v156_v46 = vsub.s32 2, %v147_v42  ;;  %v160_v47 = vsub.s32 3, %v147_v42 }
  0x5a   :  { %3536 = vst [vmem:[#allocation32_spill] sm:$0xff] %v3002_v11  ;;  %3537 = vst [vmem:[#allocation33_spill] sm:$0xff] %v3004_v12  ;;  %v3006_v13 = vld [vmem:[#allocation9 + $0x60] sm:$0xff]  ;;  %v3008_v14 = vld [vmem:[#allocation9 + $0x68] sm:$0xff] }
  0x5b   :  { %3538 = vst [vmem:[#allocation34_spill] sm:$0xff] %v3006_v13  ;;  %3539 = vst [vmem:[#allocation35_spill] sm:$0xff] %v3008_v14  ;;  %v3010_v15 = vld [vmem:[#allocation9 + $0x70] sm:$0xff]  ;;  %v3012_v16 = vld [vmem:[#allocation9 + $0x78] sm:$0xff] }
  0x5c   :  { %3540 = vst [vmem:[#allocation36_spill] sm:$0xff] %v3010_v15  ;;  %3541 = vst [vmem:[#allocation37_spill] sm:$0xff] %v3012_v16  ;;  %v3014_v17 = vld [vmem:[#allocation9 + $0x80] sm:$0xff]  ;;  %v3016_v18 = vld [vmem:[#allocation9 + $0x88] sm:$0xff] }
  0x5d   :  { %3542 = vst [vmem:[#allocation38_spill] sm:$0xff] %v3014_v17  ;;  %3543 = vst [vmem:[#allocation39_spill] sm:$0xff] %v3016_v18  ;;  %v3018_v19 = vld [vmem:[#allocation9 + $0x90] sm:$0xff]  ;;  %v3020_v20 = vld [vmem:[#allocation9 + $0x98] sm:$0xff] }
  0x5e   :  { %3544 = vst [vmem:[#allocation40_spill] sm:$0xff] %v3018_v19  ;;  %3545 = vst [vmem:[#allocation41_spill] sm:$0xff] %v3020_v20  ;;  %v3022_v21 = vld [vmem:[#allocation9 + $0xa0] sm:$0xff]  ;;  %v3024_v22 = vld [vmem:[#allocation9 + $0xa8] sm:$0xff] }
  0x5f   :  { %3546 = vst [vmem:[#allocation42_spill] sm:$0xff] %v3022_v21  ;;  %3547 = vst [vmem:[#allocation43_spill] sm:$0xff] %v3024_v22  ;;  %v3026_v23 = vld [vmem:[#allocation9 + $0xb0] sm:$0xff]  ;;  %v3028_v24 = vld [vmem:[#allocation9 + $0xb8] sm:$0xff] }
  0x60   :  { %3548 = vst [vmem:[#allocation44_spill] sm:$0xff] %v3026_v23  ;;  %v3030_v25 = vld [vmem:[#allocation9 + $0xc0] sm:$0xff]  ;;  %v3032_v26 = vld [vmem:[#allocation9 + $0xc8] sm:$0xff]  ;;  %v3034_v27 = vld [vmem:[#allocation9 + $0xd0] sm:$0xff] }
  0x61   :  { %v3036_v28 = vld [vmem:[#allocation9 + $0xd8] sm:$0xff]  ;;  %v3038_v29 = vld [vmem:[#allocation9 + $0xe0] sm:$0xff]  ;;  %v3040_v30 = vld [vmem:[#allocation9 + $0xe8] sm:$0xff] }
  0x62   :  { %v3042_v31 = vld [vmem:[#allocation9 + $0xf0] sm:$0xff]  ;;  %v3044_v32 = vld [vmem:[#allocation9 + $0xf8] sm:$0xff]  ;;  %v2485_v37 = vld [vmem:[#allocation4] sm:$0xff]  }
  0x63   :  { %v2479_v33 = vld [vmem:[#allocation7 + $0x4] ss:$16 sps:$4 sm:$0xff]   ;;  %v2481_v34 = vld [vmem:[#allocation7 + $0xc] ss:$16 sps:$4 sm:$0xff]   ;;  %v2483_v35 = vld [vmem:[#allocation7] ss:$16 sps:$4 sm:$0xff]  }
  0x64   :  { %233 = vmatprep.subr.bf16.mxu0 %v2479_v33  ;;  %v2484_v36 = vld [vmem:[#allocation7 + $0x8] ss:$16 sps:$4 sm:$0xff]   ;;  %306 = vmatprep.subr.bf16.mxu1 %v2481_v34  ;;  %v2487_v39 = vld [vmem:[#allocation4 + $0x10] sm:$0xff]   ;;  %v144_v45 = vld [vmem:[%s3492_s3] sm:$0xf]  ;;  %s3102_s3 = smov 0  }
  0x65   :  { %234 = vmatpush1.bf16.msra.mxu0 %v2483_v35  ;;  %307 = vmatpush1.bf16.msra.mxu1 %v2484_v36  ;;  %v2486_v38 = vld [vmem:[#allocation4 + $0x8] sm:$0xff]   ;;  %v2488_v40 = vld [vmem:[#allocation4 + $0x18] sm:$0xff]   ;;  %v3058_v48 = vrot.slane %v144_v45, %v148_v43  ;;  %v3060_v49 = vrot.slane %v144_v45, %v152_v44  ;;  %v3062_v51 = vrot.slane %v144_v45, %v156_v46 }
  0x66   :  { %v3064_v52 = vrot.slane %v144_v45, %v160_v47 }
  0x68   :  { %2105 = vmatmul.mubr.msk.bf16.vlgmr.msra.gmra.mxu0 %vm206_vm0, %v2485_v37  ;;  %2109 = vmatmul.mubr.msk.bf16.vlgmr.msra.gmra.mxu1 %vm206_vm0, %v2485_v37 }
  0x69   :  { %261 = vmatprep.mubr.bf16.mxu0 %v2880_v0  ;;  %334 = vmatprep.mubr.bf16.mxu1 %v2880_v0 }
  0x70   :  { %2106 = vmatmul.mubr.msk.bf16.gmra.mxu0 %vm206_vm0, %v2486_v38  ;;  %2110 = vmatmul.mubr.msk.bf16.gmra.mxu1 %vm206_vm0, %v2486_v38 }
  0x71   :  { %271 = vmatprep.mubr.bf16.mxu0 %v2880_v0  ;;  %344 = vmatprep.mubr.bf16.mxu1 %v2880_v0 }
  0x78   :  { %2107 = vmatmul.mubr.msk.bf16.gmra.mxu0 %vm206_vm0, %v2487_v39  ;;  %2111 = vmatmul.mubr.msk.bf16.gmra.mxu1 %vm206_vm0, %v2487_v39 }
  0x79   :  { %281 = vmatprep.mubr.bf16.mxu0 %v2880_v0  ;;  %354 = vmatprep.mubr.bf16.mxu1 %v2880_v0 }
  0x80   :  { %2108 = vmatmul.mubr.msk.bf16.gmra.mxu0 %vm206_vm0, %v2488_v40  ;;  %2112 = vmatmul.mubr.msk.bf16.gmra.mxu1 %vm206_vm0, %v2488_v40 }
 0x128   :  { %v253_v50 = vpop.f32.mrf.mxu0  ;;  %v326_v53 = vpop.f32.mrf.mxu1 }
 0x129   :  { %v254_v55 = vadd.f32 %v253_v50, %v3058_v48  ;;  %v327_v58 = vadd.f32 %v326_v53, %v3062_v51 }
 0x12a   :  { %v255_v54 = vpop.f32.mrf.mxu0  ;;  %v328_v57 = vpop.f32.mrf.mxu1 }
 0x12b   :  { %v256_v56 = vadd.f32 %v255_v54, %v3060_v49  ;;  %v329_v59 = vadd.f32 %v328_v57, %v3064_v52 }
 0x12c   :  { %v257_v60 = vpop.f32.mrf.mxu0  ;;  %v330_v62 = vpop.f32.mrf.mxu1 }
 0x12d   :  { %v2245_v61 = vpack.c.bf16 %v256_v56, %v254_v55  ;;  %v2246_v63 = vpack.c.bf16 %v329_v59, %v327_v58  ;;  %v258_v33 = vadd.f32 %v257_v60, %v3058_v48  ;;  %v331_v36 = vadd.f32 %v330_v62, %v3062_v51 }
 0x12e   :  { %v259_v0 = vpop.f32.mrf.mxu0  ;;  %v332_v35 = vpop.f32.mrf.mxu1 }
 0x12f   :  { %493 = vst [vmem:[#allocation2] sm:$0xff] %v2245_v61  ;;  %v260_v34 = vadd.f32 %v259_v0, %v3060_v49  ;;  %494 = vst [vmem:[#allocation2 + $0x8] sm:$0xff] %v2246_v63  ;;  %v333_v37 = vadd.f32 %v332_v35, %v3064_v52 }
 0x130   :  { %v263_v38 = vpop.f32.mrf.mxu0  ;;  %v336_v40 = vpop.f32.mrf.mxu1 }
 0x131   :  { %v2247_v39 = vpack.c.bf16 %v260_v34, %v258_v33  ;;  %v2248_v42 = vpack.c.bf16 %v333_v37, %v331_v36  ;;  %v264_v44 = vadd.f32 %v263_v38, %v3058_v48  ;;  %v337_v47 = vadd.f32 %v336_v40, %v3062_v51 }
 0x132   :  { %v265_v43 = vpop.f32.mrf.mxu0  ;;  %v338_v46 = vpop.f32.mrf.mxu1 }
 0x133   :  { %495 = vst [vmem:[#allocation2 + $0x10] sm:$0xff] %v2247_v39  ;;  %v266_v45 = vadd.f32 %v265_v43, %v3060_v49  ;;  %496 = vst [vmem:[#allocation2 + $0x18] sm:$0xff] %v2248_v42  ;;  %v339_v50 = vadd.f32 %v338_v46, %v3064_v52 }
 0x134   :  { %v267_v53 = vpop.f32.mrf.mxu0  ;;  %v340_v55 = vpop.f32.mrf.mxu1 }
 0x135   :  { %v2249_v54 = vpack.c.bf16 %v266_v45, %v264_v44  ;;  %v2250_v56 = vpack.c.bf16 %v339_v50, %v337_v47  ;;  %v268_v58 = vadd.f32 %v267_v53, %v3058_v48  ;;  %v341_v61 = vadd.f32 %v340_v55, %v3062_v51 }
 0x136   :  { %v269_v57 = vpop.f32.mrf.mxu0  ;;  %v342_v60 = vpop.f32.mrf.mxu1 }
 0x137   :  { %497 = vst [vmem:[#allocation2 + $0x20] sm:$0xff] %v2249_v54  ;;  %v270_v59 = vadd.f32 %v269_v57, %v3060_v49  ;;  %498 = vst [vmem:[#allocation2 + $0x28] sm:$0xff] %v2250_v56  ;;  %v343_v62 = vadd.f32 %v342_v60, %v3064_v52 }
 0x138   :  { %v273_v63 = vpop.f32.mrf.mxu0  ;;  %v346_v33 = vpop.f32.mrf.mxu1 }
 0x139   :  { %v2251_v0 = vpack.c.bf16 %v270_v59, %v268_v58  ;;  %v2252_v34 = vpack.c.bf16 %v343_v62, %v341_v61  ;;  %v274_v36 = vadd.f32 %v273_v63, %v3058_v48  ;;  %v347_v39 = vadd.f32 %v346_v33, %v3062_v51 }
 0x13a   :  { %v275_v35 = vpop.f32.mrf.mxu0  ;;  %v348_v38 = vpop.f32.mrf.mxu1 }
 0x13b   :  { %499 = vst [vmem:[#allocation2 + $0x30] sm:$0xff] %v2251_v0  ;;  %v276_v37 = vadd.f32 %v275_v35, %v3060_v49  ;;  %500 = vst [vmem:[#allocation2 + $0x38] sm:$0xff] %v2252_v34  ;;  %v349_v40 = vadd.f32 %v348_v38, %v3064_v52 }
 0x13c   :  { %v277_v42 = vpop.f32.mrf.mxu0  ;;  %v350_v44 = vpop.f32.mrf.mxu1 }
 0x13d   :  { %v2253_v43 = vpack.c.bf16 %v276_v37, %v274_v36  ;;  %v2254_v45 = vpack.c.bf16 %v349_v40, %v347_v39  ;;  %v278_v47 = vadd.f32 %v277_v42, %v3058_v48  ;;  %v351_v54 = vadd.f32 %v350_v44, %v3062_v51 }
 0x13e   :  { %v279_v46 = vpop.f32.mrf.mxu0  ;;  %v352_v53 = vpop.f32.mrf.mxu1 }
 0x13f   :  { %501 = vst [vmem:[#allocation2 + $0x40] sm:$0xff] %v2253_v43  ;;  %v280_v50 = vadd.f32 %v279_v46, %v3060_v49  ;;  %502 = vst [vmem:[#allocation2 + $0x48] sm:$0xff] %v2254_v45  ;;  %v353_v55 = vadd.f32 %v352_v53, %v3064_v52 }
 0x140   :  { %v283_v56 = vpop.f32.mrf.mxu0  ;;  %v356_v58 = vpop.f32.mrf.mxu1 }
 0x141   :  { %v2255_v57 = vpack.c.bf16 %v280_v50, %v278_v47  ;;  %v2256_v59 = vpack.c.bf16 %v353_v55, %v351_v54  ;;  %v284_v61 = vadd.f32 %v283_v56, %v3058_v48  ;;  %v357_v0 = vadd.f32 %v356_v58, %v3062_v51 }
 0x142   :  { %v285_v60 = vpop.f32.mrf.mxu0  ;;  %v358_v63 = vpop.f32.mrf.mxu1  ;;  %v3098_v47 = vmov 0.0   ;;  %v3100_v50 = vmov 0.0  }
 0x143   :  { %503 = vst [vmem:[#allocation2 + $0x50] sm:$0xff] %v2255_v57  ;;  %v286_v62 = vadd.f32 %v285_v60, %v3060_v49  ;;  %504 = vst [vmem:[#allocation2 + $0x58] sm:$0xff] %v2256_v59  ;;  %v359_v33 = vadd.f32 %v358_v63, %v3064_v52 }
 0x144   :  { %v287_v34 = vpop.f32.mrf.mxu0  ;;  %v360_v36 = vpop.f32.mrf.mxu1 }
 0x145   :  { %v2257_v35 = vpack.c.bf16 %v286_v62, %v284_v61  ;;  %v2258_v37 = vpack.c.bf16 %v359_v33, %v357_v0  ;;  %v288_v39 = vadd.f32 %v287_v34, %v3058_v48  ;;  %v361_v43 = vadd.f32 %v360_v36, %v3062_v51 }
 0x146   :  { %v289_v38 = vpop.f32.mrf.mxu0  ;;  %v362_v42 = vpop.f32.mrf.mxu1 }
 0x147   :  { %505 = vst [vmem:[#allocation2 + $0x60] sm:$0xff] %v2257_v35  ;;  %v290_v40 = vadd.f32 %v289_v38, %v3060_v49  ;;  %506 = vst [vmem:[#allocation2 + $0x68] sm:$0xff] %v2258_v37  ;;  %v363_v44 = vadd.f32 %v362_v42, %v3064_v52 }
 0x149   :  { %v2259_v45 = vpack.c.bf16 %v290_v40, %v288_v39  ;;  %v2260_v46 = vpack.c.bf16 %v363_v44, %v361_v43 }
 0x14b   :  { %507 = vst [vmem:[#allocation2 + $0x70] sm:$0xff] %v2259_v45  ;;  %508 = vst [vmem:[#allocation2 + $0x78] sm:$0xff] %v2260_v46 }
 0x14c LB: > { %v3549_v23 = vld [vmem:[#allocation44_spill] sm:$0xff]  ;;  %v3550_v22 = vld [vmem:[#allocation43_spill] sm:$0xff]  ;;  %v3551_v21 = vld [vmem:[#allocation42_spill] sm:$0xff]  ;;  %v3115_v48 = vcombine.high %v3038_v29, %v3042_v31  ;;  %v3119_v49 = vcombine.low %v3038_v29, %v3042_v31  ;;  %v3123_v51 = vcombine.high %v3030_v25, %v3034_v27  ;;  %v3127_v52 = vcombine.high %v3040_v30, %v3044_v32  ;;  %s2262_s1 = sshll.u32 %s2867_s3, 6  ;;  %s2263_s30 = sshll.u32 %s2867_s3, 4  ;;  %v2863_v50 = vphi %v3100_v50, %v1201_v50   ;;  %v2859_v47 = vphi %v3098_v47, %v1199_v47   ;;  %s2867_s3 = sphi %s3102_s3, %s546_s3  }
 0x14d   : > { %v3552_v20 = vld [vmem:[#allocation41_spill] sm:$0xff]  ;;  %v3553_v19 = vld [vmem:[#allocation40_spill] sm:$0xff]  ;;  %v3554_v18 = vld [vmem:[#allocation39_spill] sm:$0xff]  ;;  %v3132_v53 = vcombine.low %v3040_v30, %v3044_v32  ;;  %v3136_v54 = vcombine.high %v3032_v26, %v3036_v28  ;;  %v3141_v55 = vcombine.low %v3030_v25, %v3034_v27  ;;  %v3147_v56 = vcombine.high %v3551_v21, %v3549_v23  ;;  %s3314_s29 = scalar_lea.vmem [#allocation2], %s2262_s1  ;;  %s3323_s11 = scalar_lea.vmem [#allocation3], %s2263_s30 }
 0x14e   : > { %v3555_v17 = vld [vmem:[#allocation38_spill] sm:$0xff]  ;;  %v3556_v16 = vld [vmem:[#allocation37_spill] sm:$0xff]  ;;  %v3557_v15 = vld [vmem:[#allocation36_spill] sm:$0xff]  ;;  %716 = vmatprep.subr.bf16.mxu0 %v3115_v48  ;;  %757 = vmatprep.subr.bf16.mxu1 %v3127_v52  ;;  %v3152_v57 = vcombine.low %v3032_v26, %v3036_v28  ;;  %v3157_v58 = vcombine.high %v3550_v22, %v3028_v24  ;;  %v3501_v59 = vmov 0   ;;  %v3163_v60 = vcombine.low %v3551_v21, %v3549_v23  ;;  %s546_s3 = sadd.s32 1, %s2867_s3  }
 0x14f   : > { %v3558_v14 = vld [vmem:[#allocation35_spill] sm:$0xff]  ;;  %v3559_v13 = vld [vmem:[#allocation34_spill] sm:$0xff]  ;;  %v3560_v12 = vld [vmem:[#allocation33_spill] sm:$0xff]  ;;  %717 = vmatpush1.bf16.msra.mxu0 %v3119_v49  ;;  %758 = vmatpush1.bf16.msra.mxu1 %v3132_v53  ;;  %v3169_v61 = vcombine.high %v3555_v17, %v3553_v19  ;;  %v3174_v62 = vcombine.low %v3550_v22, %v3028_v24  ;;  %v3179_v63 = vcombine.high %v3554_v18, %v3552_v20  ;;  %p543_p7 = scmp.ge.s32.totalorder %s546_s3, 2  }
 0x150   : > { %v3561_v11 = vld [vmem:[#allocation32_spill] sm:$0xff]  ;;  %v3562_v10 = vld [vmem:[#allocation31_spill] sm:$0xff]  ;;  %v3563_v9 = vld [vmem:[#allocation30_spill] sm:$0xff]  ;;  %718 = vmatprep.subr.bf16.mxu0 %v3123_v51  ;;  %759 = vmatprep.subr.bf16.mxu1 %v3136_v54  ;;  %v3184_v0 = vcombine.low %v3555_v17, %v3553_v19  ;;  %v3189_v33 = vcombine.high %v3559_v13, %v3557_v15  ;;  %v3194_v34 = vcombine.low %v3554_v18, %v3552_v20 }
 0x151   : > { %v3564_v8 = vld [vmem:[#allocation29_spill] sm:$0xff]  ;;  %v3566_v3 = vld [vmem:[#allocation24_spill] sm:$0xff]  ;;  %v3567_v2 = vld [vmem:[#allocation23_spill] sm:$0xff]  ;;  %748 = vmatprep.mubr.bf16.mxu0 %v3501_v59  ;;  %789 = vmatprep.mubr.bf16.mxu1 %v3501_v59  ;;  %v3199_v35 = vcombine.high %v3558_v14, %v3556_v16  ;;  %v3204_v36 = vcombine.low %v3559_v13, %v3557_v15  ;;  %v3209_v37 = vcombine.high %v3563_v9, %v3561_v11 }
 0x152   : > { %v3565_v4 = vld [vmem:[#allocation25_spill] sm:$0xff]  ;;  %v3568_v1 = vld [vmem:[#allocation22_spill] sm:$0xff]  ;;  %v3569_v7 = vld [vmem:[#allocation28_spill] sm:$0xff]  ;;  %v3214_v38 = vcombine.low %v3558_v14, %v3556_v16  ;;  %v3219_v39 = vcombine.high %v3562_v10, %v3560_v12  ;;  %v3224_v40 = vcombine.low %v3563_v9, %v3561_v11  ;;  %v3234_v43 = vcombine.low %v3562_v10, %v3560_v12 }
 0x153   : > { %v3570_v6 = vld [vmem:[#allocation27_spill] sm:$0xff]  ;;  %v3571_v5 = vld [vmem:[#allocation26_spill] sm:$0xff]  ;;  %719 = vmatpush1.bf16.msra.mxu0 %v3141_v55  ;;  %760 = vmatpush1.bf16.msra.mxu1 %v3152_v57  ;;  %v3249_v46 = vcombine.high %v3568_v1, %v3566_v3  ;;  %v3259_v59 = vcombine.high %v3567_v2, %v3565_v4  ;;  %v2560_v24 = vld [vmem:[#allocation10 + $0x10] sm:$0xff] (%p543_p7)  }
 0x154   : > { %720 = vmatprep.subr.bf16.mxu0 %v3147_v56  ;;  %761 = vmatprep.subr.bf16.mxu1 %v3157_v58  ;;  %v3229_v42 = vcombine.high %v3571_v5, %v3569_v7  ;;  %v3239_v44 = vcombine.high %v3570_v6, %v3564_v8  ;;  %v3244_v45 = vcombine.low %v3571_v5, %v3569_v7  ;;  %v554_v14 = vld [vmem:[%s3314_s29 + $0x8] sm:$0xff]  ;;  %v2562_v26 = vld [vmem:[#allocation10] sm:$0xff] (%p543_p7)   ;;  %v2571_v32 = vld [vmem:[#allocation12 + $0x18] sm:$0xff] (%p543_p7)  }
 0x155   : > { %v3254_v41 = vcombine.low %v3570_v6, %v3564_v8  ;;  %v3264_v5 = vcombine.low %v3568_v1, %v3566_v3  ;;  %v3270_v6 = vcombine.low %v3567_v2, %v3565_v4  ;;  %v555_v7 = vpack.c.bf16 %v2863_v50, %v2863_v50  ;;  %v2561_v25 = vld [vmem:[#allocation10 + $0x8] sm:$0xff] (%p543_p7)   ;;  %v2570_v31 = vld [vmem:[#allocation12 + $0x20] sm:$0xff] (%p543_p7)  }
 0x156   : > { %v3572_v1 = vmov 0   ;;  %v800_v18 = vunpack.c.l.bf16 %v554_v14  ;;  %v801_v21 = vunpack.c.h.bf16 %v554_v14  ;;  %v2569_v30 = vld [vmem:[#allocation12 + $0x28] sm:$0xff] (%p543_p7)  }
 0x157   : > { %721 = vmatpush1.bf16.msra.mxu0 %v3163_v60  ;;  %762 = vmatpush1.bf16.msra.mxu1 %v3174_v62 }
 0x158   : > { %722 = vmatprep.subr.bf16.mxu0 %v3169_v61  ;;  %763 = vmatprep.subr.bf16.mxu1 %v3179_v63 }
 0x15b   : > { %723 = vmatpush1.bf16.msra.mxu0 %v3184_v0  ;;  %764 = vmatpush1.bf16.msra.mxu1 %v3194_v34 }
 0x15c   : > { %724 = vmatprep.subr.bf16.mxu0 %v3189_v33  ;;  %765 = vmatprep.subr.bf16.mxu1 %v3199_v35 }
 0x15f   : > { %725 = vmatpush1.bf16.msra.mxu0 %v3204_v36  ;;  %766 = vmatpush1.bf16.msra.mxu1 %v3214_v38 }
 0x160   : > { %726 = vmatprep.subr.bf16.mxu0 %v3209_v37  ;;  %767 = vmatprep.subr.bf16.mxu1 %v3219_v39 }
 0x163   : > { %727 = vmatpush1.bf16.msra.mxu0 %v3224_v40  ;;  %768 = vmatpush1.bf16.msra.mxu1 %v3234_v43 }
 0x164   : > { %728 = vmatprep.subr.bf16.mxu0 %v3229_v42  ;;  %769 = vmatprep.subr.bf16.mxu1 %v3239_v44 }
 0x167   : > { %729 = vmatpush1.bf16.msra.mxu0 %v3244_v45  ;;  %770 = vmatpush1.bf16.msra.mxu1 %v3254_v41 }
 0x168   : > { %730 = vmatprep.subr.bf16.mxu0 %v3249_v46  ;;  %771 = vmatprep.subr.bf16.mxu1 %v3259_v59 }
 0x16b   : > { %731 = vmatpush1.bf16.msra.mxu0 %v3264_v5  ;;  %772 = vmatpush1.bf16.msra.mxu1 %v3270_v6 }
 0x16c   : > { %840 = vmatprep.subr.bf16.mxu0 %v3115_v48  ;;  %881 = vmatprep.subr.bf16.mxu1 %v3127_v52 }
 0x16e   : > { %749 = vmatmul.mubr.bf16.vlgmr.msra.gmra.mxu0 %v555_v7  ;;  %790 = vmatmul.mubr.bf16.vlgmr.msra.gmra.mxu1 %v555_v7  ;;  %v553_v7 = vld [vmem:[%s3314_s29] sm:$0xff] }
 0x16f   : > { %841 = vmatpush1.bf16.msra.mxu0 %v3119_v49  ;;  %882 = vmatpush1.bf16.msra.mxu1 %v3132_v53  ;;  %v798_v50 = vunpack.c.l.bf16 %v553_v7  ;;  %v799_v2 = vunpack.c.h.bf16 %v553_v7 }
 0x170   : > { %842 = vmatprep.subr.bf16.mxu0 %v3123_v51  ;;  %883 = vmatprep.subr.bf16.mxu1 %v3136_v54 }
 0x171   : > { %872 = vmatprep.mubr.bf16.mxu0 %v3572_v1  ;;  %913 = vmatprep.mubr.bf16.mxu1 %v3572_v1 }
 0x173   : > { %843 = vmatpush1.bf16.msra.mxu0 %v3141_v55  ;;  %884 = vmatpush1.bf16.msra.mxu1 %v3152_v57 }
 0x174   : > { %844 = vmatprep.subr.bf16.mxu0 %v3147_v56  ;;  %885 = vmatprep.subr.bf16.mxu1 %v3157_v58 }
 0x177   : > { %845 = vmatpush1.bf16.msra.mxu0 %v3163_v60  ;;  %886 = vmatpush1.bf16.msra.mxu1 %v3174_v62 }
 0x178   : > { %846 = vmatprep.subr.bf16.mxu0 %v3169_v61  ;;  %887 = vmatprep.subr.bf16.mxu1 %v3179_v63 }
 0x17b   : > { %847 = vmatpush1.bf16.msra.mxu0 %v3184_v0  ;;  %888 = vmatpush1.bf16.msra.mxu1 %v3194_v34 }
 0x17c   : > { %848 = vmatprep.subr.bf16.mxu0 %v3189_v33  ;;  %889 = vmatprep.subr.bf16.mxu1 %v3199_v35 }
 0x17f   : > { %849 = vmatpush1.bf16.msra.mxu0 %v3204_v36  ;;  %890 = vmatpush1.bf16.msra.mxu1 %v3214_v38 }
 0x180   : > { %850 = vmatprep.subr.bf16.mxu0 %v3209_v37  ;;  %891 = vmatprep.subr.bf16.mxu1 %v3219_v39 }
 0x183   : > { %851 = vmatpush1.bf16.msra.mxu0 %v3224_v40  ;;  %892 = vmatpush1.bf16.msra.mxu1 %v3234_v43 }
 0x184   : > { %852 = vmatprep.subr.bf16.mxu0 %v3229_v42  ;;  %893 = vmatprep.subr.bf16.mxu1 %v3239_v44 }
 0x187   : > { %853 = vmatpush1.bf16.msra.mxu0 %v3244_v45  ;;  %894 = vmatpush1.bf16.msra.mxu1 %v3254_v41 }
 0x188   : > { %854 = vmatprep.subr.bf16.mxu0 %v3249_v46  ;;  %895 = vmatprep.subr.bf16.mxu1 %v3259_v59 }
 0x18b   : > { %855 = vmatpush1.bf16.msra.mxu0 %v3264_v5  ;;  %896 = vmatpush1.bf16.msra.mxu1 %v3270_v6 }
 0x18c   : > { %964 = vmatprep.subr.bf16.mxu0 %v3115_v48  ;;  %1005 = vmatprep.subr.bf16.mxu1 %v3127_v52 }
 0x22e   : > { %v750_v3 = vpop.f32.mrf.mxu0  ;;  %v791_v8 = vpop.f32.mrf.mxu1 }
 0x22f   : > { %v802_v4 = vadd.f32 %v798_v50, %v750_v3  ;;  %v804_v20 = vadd.f32 %v800_v18, %v791_v8 }
 0x230   : > { %v752_v9 = vpop.f32.mrf.mxu0  ;;  %v793_v12 = vpop.f32.mrf.mxu1 }
 0x231   : > { %v2164_v10 = vmul.f32 -1.442695, %v802_v4  ;;  %v803_v11 = vadd.f32 %v799_v2, %v752_v9  ;;  %v2166_v22 = vmul.f32 -1.442695, %v804_v20  ;;  %v805_v7 = vadd.f32 %v801_v21, %v793_v12 }
 0x232   : > { %v754_v13 = vpop.f32.mrf.mxu0  ;;  %v795_v16 = vpop.f32.mrf.mxu1 }
 0x233   : > { %2489 = vpow2.f32 %v2164_v10  ;;  %v2165_v15 = vmul.f32 -1.442695, %v803_v11 }
 0x234   : > { %v755_v17 = vpop.f32.mrf.mxu0  ;;  %v796_v19 = vpop.f32.mrf.mxu1 }
 0x235   : > { %2491 = vpow2.f32 %v2165_v15  ;;  %v2170_v19 = vld [vmem:[%s3314_s29 + $0x10] sm:$0xff] }
 0x236   : > { %2493 = vpow2.f32 %v2166_v22  ;;  %v922_v20 = vunpack.c.l.bf16 %v2170_v19  ;;  %v923_v21 = vunpack.c.h.bf16 %v2170_v19 }
 0x237   : > { %2495 = vtanh.f32 %v805_v7 }
 0x240   : > { %v2490_v23 = vpop.eup %2489 }
 0x241   : > { %v815_v3 = vadd.f32 1.0, %v2490_v23 }
 0x242   : > { %v2492_v50 = vpop.eup %2491 }
 0x243   : > { %2497 = vrcp.f32 %v815_v3  ;;  %v816_v2 = vadd.f32 1.0, %v2492_v50  ;;  %v2494_v4 = vpop.eup %2493 }
 0x244   : > { %v2496_v9 = vpop.eup %2495  ;;  %v817_v13 = vadd.f32 1.0, %v2494_v4 }
 0x245   : > { %2499 = vrcp.f32 %v816_v2 }
 0x246   : > { %2501 = vrcp.f32 %v817_v13 }
 0x250   : > { %v2498_v10 = vpop.eup %2497 }
 0x251   : > { %v826_v8 = vmul.f32 %v2498_v10, %v2496_v9  ;;  %v2171_v10 = vld [vmem:[%s3314_s29 + $0x18] sm:$0xff] }
 0x252   : > { %v2500_v11 = vpop.eup %2499 }
 0x253   : > { %v825_v15 = vmul.f32 %v2859_v47, %v2500_v11  ;;  %v2502_v12 = vpop.eup %2501 }
 0x255   : > { %v3319_v14 = vadd.f32 %v826_v8, %v825_v15  ;;  %v925_v8 = vunpack.c.h.bf16 %v2171_v10 }
 0x257   : > { %2503 = vtanh.f32 %v3319_v14 }
 0x264   : > { %v2504_v16 = vpop.eup %2503 }
 0x265   : > { %v829_v17 = vmul.f32 %v2504_v16, %v2502_v12 }
 0x267   : > { %v830_v18 = vpack.c.bf16 %v829_v17, %v829_v17 }
 0x269   : > { %833 = vst [vmem:[%s3323_s11] sm:$0xf] %v830_v18  ;;  %873 = vmatmul.mubr.bf16.vlgmr.msra.gmra.mxu0 %v830_v18  ;;  %914 = vmatmul.mubr.bf16.vlgmr.msra.gmra.mxu1 %v830_v18 }
 0x26a   : > { %965 = vmatpush1.bf16.msra.mxu0 %v3119_v49  ;;  %1006 = vmatpush1.bf16.msra.mxu1 %v3132_v53 }
 0x26b   : > { %966 = vmatprep.subr.bf16.mxu0 %v3123_v51  ;;  %1007 = vmatprep.subr.bf16.mxu1 %v3136_v54 }
 0x26c   : > { %996 = vmatprep.mubr.bf16.mxu0 %v3572_v1  ;;  %1037 = vmatprep.mubr.bf16.mxu1 %v3572_v1 }
 0x26e   : > { %967 = vmatpush1.bf16.msra.mxu0 %v3141_v55  ;;  %1008 = vmatpush1.bf16.msra.mxu1 %v3152_v57 }
 0x26f   : > { %968 = vmatprep.subr.bf16.mxu0 %v3147_v56  ;;  %1009 = vmatprep.subr.bf16.mxu1 %v3157_v58 }
 0x272   : > { %969 = vmatpush1.bf16.msra.mxu0 %v3163_v60  ;;  %1010 = vmatpush1.bf16.msra.mxu1 %v3174_v62 }
 0x273   : > { %970 = vmatprep.subr.bf16.mxu0 %v3169_v61  ;;  %1011 = vmatprep.subr.bf16.mxu1 %v3179_v63 }
 0x276   : > { %971 = vmatpush1.bf16.msra.mxu0 %v3184_v0  ;;  %1012 = vmatpush1.bf16.msra.mxu1 %v3194_v34 }
 0x277   : > { %972 = vmatprep.subr.bf16.mxu0 %v3189_v33  ;;  %1013 = vmatprep.subr.bf16.mxu1 %v3199_v35 }
 0x27a   : > { %973 = vmatpush1.bf16.msra.mxu0 %v3204_v36  ;;  %1014 = vmatpush1.bf16.msra.mxu1 %v3214_v38 }
 0x27b   : > { %974 = vmatprep.subr.bf16.mxu0 %v3209_v37  ;;  %1015 = vmatprep.subr.bf16.mxu1 %v3219_v39 }
 0x27e   : > { %975 = vmatpush1.bf16.msra.mxu0 %v3224_v40  ;;  %1016 = vmatpush1.bf16.msra.mxu1 %v3234_v43 }
 0x27f   : > { %976 = vmatprep.subr.bf16.mxu0 %v3229_v42  ;;  %1017 = vmatprep.subr.bf16.mxu1 %v3239_v44 }
 0x282   : > { %977 = vmatpush1.bf16.msra.mxu0 %v3244_v45  ;;  %1018 = vmatpush1.bf16.msra.mxu1 %v3254_v41 }
 0x283   : > { %978 = vmatprep.subr.bf16.mxu0 %v3249_v46  ;;  %1019 = vmatprep.subr.bf16.mxu1 %v3259_v59 }
 0x286   : > { %979 = vmatpush1.bf16.msra.mxu0 %v3264_v5  ;;  %1020 = vmatpush1.bf16.msra.mxu1 %v3270_v6 }
 0x287   : > { %1088 = vmatprep.subr.bf16.mxu0 %v3115_v48  ;;  %1129 = vmatprep.subr.bf16.mxu1 %v3127_v52  ;;  %v924_v48 = vunpack.c.l.bf16 %v2171_v10 }
 0x329   : > { %v874_v22 = vpop.f32.mrf.mxu0  ;;  %v915_v23 = vpop.f32.mrf.mxu1 }
 0x32a   : > { %v926_v47 = vadd.f32 %v922_v20, %v874_v22  ;;  %v928_v52 = vadd.f32 %v924_v48, %v915_v23 }
 0x32b   : > { %v876_v7 = vpop.f32.mrf.mxu0  ;;  %v917_v3 = vpop.f32.mrf.mxu1 }
 0x32c   : > { %v2172_v50 = vmul.f32 -1.442695, %v926_v47  ;;  %v927_v2 = vadd.f32 %v923_v21, %v876_v7  ;;  %v2174_v12 = vmul.f32 -1.442695, %v928_v52  ;;  %v929_v17 = vadd.f32 %v925_v8, %v917_v3 }
 0x32d   : > { %v878_v4 = vpop.f32.mrf.mxu0  ;;  %v919_v9 = vpop.f32.mrf.mxu1 }
 0x32e   : > { %2505 = vpow2.f32 %v2172_v50  ;;  %v2173_v11 = vmul.f32 -1.442695, %v927_v2 }
 0x32f   : > { %v879_v13 = vpop.f32.mrf.mxu0  ;;  %v920_v15 = vpop.f32.mrf.mxu1 }
 0x330   : > { %2507 = vpow2.f32 %v2173_v11 }
 0x331   : > { %2509 = vpow2.f32 %v2174_v12  ;;  %v2190_v12 = vld [vmem:[%s3314_s29 + $0x30] sm:$0xff] }
 0x33b   : > { %v2506_v16 = vpop.eup %2505 }
 0x33c   : > { %v939_v18 = vadd.f32 1.0, %v2506_v16  ;;  %v1170_v16 = vunpack.c.l.bf16 %v2190_v12 }
 0x33d   : > { %v2508_v19 = vpop.eup %2507 }
 0x33e   : > { %2511 = vrcp.f32 %v939_v18  ;;  %v940_v20 = vadd.f32 1.0, %v2508_v19  ;;  %v2510_v21 = vpop.eup %2509 }
 0x33f   : > { %2513 = vtanh.f32 %v929_v17  ;;  %v941_v50 = vadd.f32 1.0, %v2510_v21  ;;  %v1171_v17 = vunpack.c.h.bf16 %v2190_v12 }
 0x340   : > { %2515 = vrcp.f32 %v940_v20 }
 0x341   : > { %2517 = vrcp.f32 %v941_v50 }
 0x34b   : > { %v2512_v22 = vpop.eup %2511 }
 0x34c   : > { %v2514_v47 = vpop.eup %2513 }
 0x34d   : > { %v2516_v7 = vpop.eup %2515  ;;  %v950_v23 = vmul.f32 %v2514_v47, %v2512_v22 }
 0x34e   : > { %v949_v2 = vmul.f32 %v2516_v7, %v3319_v14  ;;  %v2518_v3 = vpop.eup %2517 }
 0x350   : > { %v3363_v4 = vadd.f32 %v950_v23, %v949_v2  ;;  %v2191_v23 = vld [vmem:[%s3314_s29 + $0x38] sm:$0xff] }
 0x352   : > { %2519 = vtanh.f32 %v3363_v4 }
 0x35f   : > { %v2520_v9 = vpop.eup %2519 }
 0x360   : > { %v953_v10 = vmul.f32 %v2520_v9, %v2518_v3 }
 0x362   : > { %v954_v11 = vpack.c.bf16 %v953_v10, %v953_v10  ;;  %v1172_v10 = vunpack.c.l.bf16 %v2191_v23 }
 0x364   : > { %2177 = vst [vmem:[%s3323_s11 + $0x4] sm:$0xf] %v954_v11  ;;  %997 = vmatmul.mubr.bf16.vlgmr.msra.gmra.mxu0 %v954_v11  ;;  %1038 = vmatmul.mubr.bf16.vlgmr.msra.gmra.mxu1 %v954_v11 }
 0x365   : > { %1089 = vmatpush1.bf16.msra.mxu0 %v3119_v49  ;;  %1130 = vmatpush1.bf16.msra.mxu1 %v3132_v53 }
 0x366   : > { %1090 = vmatprep.subr.bf16.mxu0 %v3123_v51  ;;  %1131 = vmatprep.subr.bf16.mxu1 %v3136_v54 }
 0x367   : > { %1120 = vmatprep.mubr.bf16.mxu0 %v3572_v1  ;;  %1161 = vmatprep.mubr.bf16.mxu1 %v3572_v1  ;;  %v2180_v1 = vld [vmem:[%s3314_s29 + $0x20] sm:$0xff] }
 0x368   : > { %v1046_v49 = vunpack.c.l.bf16 %v2180_v1  ;;  %v1047_v51 = vunpack.c.h.bf16 %v2180_v1  ;;  %v1173_v1 = vunpack.c.h.bf16 %v2191_v23 }
 0x369   : > { %1091 = vmatpush1.bf16.msra.mxu0 %v3141_v55  ;;  %1132 = vmatpush1.bf16.msra.mxu1 %v3152_v57 }
 0x36a   : > { %1092 = vmatprep.subr.bf16.mxu0 %v3147_v56  ;;  %1133 = vmatprep.subr.bf16.mxu1 %v3157_v58 }
 0x36d   : > { %1093 = vmatpush1.bf16.msra.mxu0 %v3163_v60  ;;  %1134 = vmatpush1.bf16.msra.mxu1 %v3174_v62  ;;  %v2181_v62 = vld [vmem:[%s3314_s29 + $0x28] sm:$0xff] }
 0x36e   : > { %1094 = vmatprep.subr.bf16.mxu0 %v3169_v61  ;;  %1135 = vmatprep.subr.bf16.mxu1 %v3179_v63 }
 0x371   : > { %1095 = vmatpush1.bf16.msra.mxu0 %v3184_v0  ;;  %1136 = vmatpush1.bf16.msra.mxu1 %v3194_v34 }
 0x372   : > { %1096 = vmatprep.subr.bf16.mxu0 %v3189_v33  ;;  %1137 = vmatprep.subr.bf16.mxu1 %v3199_v35  ;;  %v1049_v33 = vunpack.c.h.bf16 %v2181_v62 }
 0x375   : > { %1097 = vmatpush1.bf16.msra.mxu0 %v3204_v36  ;;  %1138 = vmatpush1.bf16.msra.mxu1 %v3214_v38 }
 0x376   : > { %1098 = vmatprep.subr.bf16.mxu0 %v3209_v37  ;;  %1139 = vmatprep.subr.bf16.mxu1 %v3219_v39 }
 0x379   : > { %1099 = vmatpush1.bf16.msra.mxu0 %v3224_v40  ;;  %1140 = vmatpush1.bf16.msra.mxu1 %v3234_v43 }
 0x37a   : > { %1100 = vmatprep.subr.bf16.mxu0 %v3229_v42  ;;  %1141 = vmatprep.subr.bf16.mxu1 %v3239_v44 }
 0x37d   : > { %1101 = vmatpush1.bf16.msra.mxu0 %v3244_v45  ;;  %1142 = vmatpush1.bf16.msra.mxu1 %v3254_v41 }
 0x37e   : > { %1102 = vmatprep.subr.bf16.mxu0 %v3249_v46  ;;  %1143 = vmatprep.subr.bf16.mxu1 %v3259_v59 }
 0x381   : > { %1103 = vmatpush1.bf16.msra.mxu0 %v3264_v5  ;;  %1144 = vmatpush1.bf16.msra.mxu1 %v3270_v6  ;;  %v1048_v5 = vunpack.c.l.bf16 %v2181_v62 }
 0x424   : > { %v998_v53 = vpop.f32.mrf.mxu0  ;;  %v1039_v54 = vpop.f32.mrf.mxu1 }
 0x425   : > { %v1050_v55 = vadd.f32 %v1046_v49, %v998_v53  ;;  %v1052_v6 = vadd.f32 %v1048_v5, %v1039_v54 }
 0x426   : > { %v1000_v56 = vpop.f32.mrf.mxu0  ;;  %v1041_v57 = vpop.f32.mrf.mxu1 }
 0x427   : > { %v2182_v58 = vmul.f32 -1.442695, %v1050_v55  ;;  %v1051_v60 = vadd.f32 %v1047_v51, %v1000_v56  ;;  %v2184_v34 = vmul.f32 -1.442695, %v1052_v6  ;;  %v1053_v36 = vadd.f32 %v1049_v33, %v1041_v57  ;;  %v2555_v6 = vld [vmem:[#allocation10 + $0x38] sm:$0xff] (%p543_p7)   ;;  %v2556_v33 = vld [vmem:[#allocation10 + $0x30] sm:$0xff] (%p543_p7)  }
 0x428   : > { %v1002_v41 = vpop.f32.mrf.mxu0  ;;  %v1043_v61 = vpop.f32.mrf.mxu1  ;;  %2341 = vmatprep.subr.bf16.mxu0 (%p543_p7), %v2555_v6 }
 0x429   : > { %2521 = vpow2.f32 %v2182_v58  ;;  %v2183_v59 = vmul.f32 -1.442695, %v1051_v60 }
 0x42a   : > { %v1003_v63 = vpop.f32.mrf.mxu0  ;;  %v1044_v0 = vpop.f32.mrf.mxu1 }
 0x42b   : > { %2523 = vpow2.f32 %v2183_v59 }
 0x42c   : > { %2525 = vpow2.f32 %v2184_v34  ;;  %v2557_v34 = vld [vmem:[#allocation10 + $0x28] sm:$0xff] (%p543_p7)  }
 0x436   : > { %v2522_v35 = vpop.eup %2521 }
 0x437   : > { %v1063_v37 = vadd.f32 1.0, %v2522_v35  ;;  %v2558_v35 = vld [vmem:[#allocation10 + $0x20] sm:$0xff] (%p543_p7)  }
 0x438   : > { %v2524_v38 = vpop.eup %2523 }
 0x439   : > { %2527 = vrcp.f32 %v1063_v37  ;;  %v1064_v39 = vadd.f32 1.0, %v2524_v38  ;;  %v2526_v40 = vpop.eup %2525  ;;  %v2559_v37 = vld [vmem:[#allocation10 + $0x18] sm:$0xff] (%p543_p7)  }
 0x43a   : > { %2529 = vtanh.f32 %v1053_v36  ;;  %v1065_v45 = vadd.f32 1.0, %v2526_v40  ;;  %v2567_v38 = vld [vmem:[#allocation12 + $0x38] sm:$0xff] (%p543_p7)   ;;  %v2572_v40 = vld [vmem:[#allocation12 + $0x10] sm:$0xff] (%p543_p7)  }
 0x43b   : > { %2531 = vrcp.f32 %v1064_v39  ;;  %v2568_v39 = vld [vmem:[#allocation12 + $0x30] sm:$0xff] (%p543_p7)   ;;  %2365 = vmatprep.subr.bf16.mxu1 (%p543_p7), %v2567_v38 }
 0x43c   : > { %2533 = vrcp.f32 %v1065_v45  ;;  %v2198_v45 = vld [vmem:[%s3494_s5] ss:$0 sm:$0xff] (%p543_p7) }
 0x446   : > { %v2528_v42 = vpop.eup %2527 }
 0x447   : > { %v2530_v43 = vpop.eup %2529 }
 0x448   : > { %v2532_v44 = vpop.eup %2531  ;;  %v1074_v14 = vmul.f32 %v2530_v43, %v2528_v42  ;;  %v2573_v42 = vld [vmem:[#allocation12 + $0x8] sm:$0xff] (%p543_p7)   ;;  %v2574_v43 = vld [vmem:[#allocation12] sm:$0xff] (%p543_p7)  }
 0x449   : > { %v1073_v46 = vmul.f32 %v2532_v44, %v3363_v4  ;;  %v2534_v15 = vpop.eup %2533 }
 0x44b   : > { %v1075_v13 = vadd.f32 %v1074_v14, %v1073_v46 }
 0x44d   : > { %2535 = vtanh.f32 %v1075_v13 }
 0x45a   : > { %v2536_v48 = vpop.eup %2535 }
 0x45b   : > { %v1077_v52 = vmul.f32 %v2536_v48, %v2534_v15 }
 0x45d   : > { %v1078_v8 = vpack.c.bf16 %v1077_v52, %v1077_v52 }
 0x45f   : > { %2187 = vst [vmem:[%s3323_s11 + $0x8] sm:$0xf] %v1078_v8  ;;  %1121 = vmatmul.mubr.bf16.vlgmr.msra.gmra.mxu0 %v1078_v8  ;;  %1162 = vmatmul.mubr.bf16.vlgmr.msra.gmra.mxu1 %v1078_v8 }
 0x460   :  { %2342 = vmatpush3.bf16.msra.mxu0 (%p543_p7), %v2555_v6  ;;  %2366 = vmatpush3.bf16.msra.mxu1 (%p543_p7), %v2567_v38  ;;  %v2882_v6 = vmov (%p543_p7), 32  }
 0x461   :  { %2343 = vmatprep.subr.bf16.mxu0 (%p543_p7), %v2556_v33  ;;  %2367 = vmatprep.subr.bf16.mxu1 (%p543_p7), %v2568_v39 }
 0x462   :  { %2553 = vset.pattern.permute.xlu0 (%p543_p7), %v2882_v6  ;;  %2554 = vset.pattern.permute.xlu1 (%p543_p7), %v2882_v6 }
 0x464   :  { %2344 = vmatpush3.bf16.msra.mxu0 (%p543_p7), %v2556_v33  ;;  %2368 = vmatpush3.bf16.msra.mxu1 (%p543_p7), %v2568_v39  ;;  %v2575_v33 = vld [vmem:[#allocation15 + $0x38] sm:$0xff] (%p543_p7)  }
 0x465   :  { %2345 = vmatprep.subr.bf16.mxu0 (%p543_p7), %v2557_v34  ;;  %2369 = vmatprep.subr.bf16.mxu1 (%p543_p7), %v2569_v30 }
 0x468   :  { %2346 = vmatpush3.bf16.msra.mxu0 (%p543_p7), %v2557_v34  ;;  %2370 = vmatpush3.bf16.msra.mxu1 (%p543_p7), %v2569_v30  ;;  %v2576_v34 = vld [vmem:[#allocation13 + $0x38] sm:$0xff] (%p543_p7)  }
 0x469   :  { %2347 = vmatprep.subr.bf16.mxu0 (%p543_p7), %v2558_v35  ;;  %2371 = vmatprep.subr.bf16.mxu1 (%p543_p7), %v2570_v31 }
 0x46c   :  { %2348 = vmatpush3.bf16.msra.mxu0 (%p543_p7), %v2558_v35  ;;  %2372 = vmatpush3.bf16.msra.mxu1 (%p543_p7), %v2570_v31  ;;  %v2577_v35 = vld [vmem:[#allocation15 + $0x30] sm:$0xff] (%p543_p7)  }
 0x46d   :  { %2349 = vmatprep.subr.bf16.mxu0 (%p543_p7), %v2559_v37  ;;  %2373 = vmatprep.subr.bf16.mxu1 (%p543_p7), %v2571_v32 }
 0x470   :  { %2350 = vmatpush3.bf16.msra.mxu0 (%p543_p7), %v2559_v37  ;;  %2374 = vmatpush3.bf16.msra.mxu1 (%p543_p7), %v2571_v32  ;;  %v2578_v37 = vld [vmem:[#allocation13 + $0x30] sm:$0xff] (%p543_p7)  }
 0x471   :  { %2351 = vmatprep.subr.bf16.mxu0 (%p543_p7), %v2560_v24  ;;  %2375 = vmatprep.subr.bf16.mxu1 (%p543_p7), %v2572_v40 }
 0x474   :  { %2352 = vmatpush3.bf16.msra.mxu0 (%p543_p7), %v2560_v24  ;;  %2376 = vmatpush3.bf16.msra.mxu1 (%p543_p7), %v2572_v40  ;;  %v2579_v24 = vld [vmem:[#allocation15 + $0x28] sm:$0xff] (%p543_p7)  }
 0x475   :  { %2353 = vmatprep.subr.bf16.mxu0 (%p543_p7), %v2561_v25  ;;  %2377 = vmatprep.subr.bf16.mxu1 (%p543_p7), %v2573_v42 }
 0x478   :  { %2354 = vmatpush3.bf16.msra.mxu0 (%p543_p7), %v2561_v25  ;;  %2378 = vmatpush3.bf16.msra.mxu1 (%p543_p7), %v2573_v42  ;;  %v2580_v25 = vld [vmem:[#allocation13 + $0x28] sm:$0xff] (%p543_p7)  }
 0x479   :  { %2355 = vmatprep.subr.bf16.mxu0 (%p543_p7), %v2562_v26  ;;  %2379 = vmatprep.subr.bf16.mxu1 (%p543_p7), %v2574_v43 }
 0x47c   :  { %2356 = vmatpush3.bf16.msra.mxu0 (%p543_p7), %v2562_v26  ;;  %2380 = vmatpush3.bf16.msra.mxu1 (%p543_p7), %v2574_v43 }
 0x47d   :  { %2389 = vmatprep.subr.bf16.mxu0 (%p543_p7), %v2575_v33  ;;  %2413 = vmatprep.subr.bf16.mxu1 (%p543_p7), %v2576_v34 }
 0x51f   : > { %v1122_v18 = vpop.f32.mrf.mxu0  ;;  %v1163_v19 = vpop.f32.mrf.mxu1 }
 0x520   : > { %v1174_v20 = vadd.f32 %v1170_v16, %v1122_v18  ;;  %v1176_v11 = vadd.f32 %v1172_v10, %v1163_v19 }
 0x521   : > { %v1124_v21 = vpop.f32.mrf.mxu0  ;;  %v1165_v22 = vpop.f32.mrf.mxu1 }
 0x522   : > { %v2192_v47 = vmul.f32 -1.442695, %v1174_v20  ;;  %v1175_v7 = vadd.f32 %v1171_v17, %v1124_v21  ;;  %v2194_v49 = vmul.f32 -1.442695, %v1176_v11  ;;  %v1177_v53 = vadd.f32 %v1173_v1, %v1165_v22 }
 0x523   : > { %v1126_v50 = vpop.f32.mrf.mxu0  ;;  %v1167_v2 = vpop.f32.mrf.mxu1 }
 0x524   : > { %2537 = vpow2.f32 %v2192_v47  ;;  %v2193_v4 = vmul.f32 -1.442695, %v1175_v7 }
 0x525   : > { %v1127_v3 = vpop.f32.mrf.mxu0  ;;  %v1168_v9 = vpop.f32.mrf.mxu1 }
 0x526   : > { %2539 = vpow2.f32 %v2193_v4 }
 0x527   : > { %2541 = vpow2.f32 %v2194_v49 }
 0x531   : > { %v2538_v51 = vpop.eup %2537 }
 0x532   : > { %v1187_v54 = vadd.f32 1.0, %v2538_v51 }
 0x533   : > { %v2540_v55 = vpop.eup %2539 }
 0x534   : > { %2543 = vrcp.f32 %v1187_v54  ;;  %v1188_v56 = vadd.f32 1.0, %v2540_v55  ;;  %v2542_v57 = vpop.eup %2541 }
 0x535   : > { %2545 = vtanh.f32 %v1177_v53  ;;  %v1189_v61 = vadd.f32 1.0, %v2542_v57 }
 0x536   : > { %2547 = vrcp.f32 %v1188_v56 }
 0x537   : > { %2549 = vrcp.f32 %v1189_v61 }
 0x541   : > { %v2544_v58 = vpop.eup %2543 }
 0x542   : > { %v2546_v60 = vpop.eup %2545 }
 0x543   : > { %v2548_v41 = vpop.eup %2547  ;;  %v1198_v59 = vmul.f32 %v2546_v60, %v2544_v58 }
 0x544   : > { %v1197_v62 = vmul.f32 %v2548_v41, %v1075_v13  ;;  %v2550_v63 = vpop.eup %2549 }
 0x546   : > { %v1199_v47 = vadd.f32 %v1198_v59, %v1197_v62  }
 0x548   : > { %2551 = vtanh.f32 %v1199_v47 }
 0x555   : > { %v2552_v0 = vpop.eup %2551 }
 0x556   : > { %v1201_v50 = vmul.f32 %v2552_v0, %v2550_v63   ;;  %545 = sbr.rel (!%p543_p7) target bundleno = 332 (0x14c), region = 103 }
 0x558   : > { %v1202_v5 = vpack.c.bf16 %v1201_v50, %v1201_v50 }
 0x55a   : > { %2197 = vst [vmem:[%s3323_s11 + $0xc] sm:$0xf] %v1202_v5 }
 0x561   :  { %v3413_v36 = vld [vmem:[#allocation3] sm:$0xff]   ;;  %v3416_v27 = vld [vmem:[#allocation3 + $0x8] sm:$0xff]   ;;  %v3418_v28 = vld [vmem:[#allocation3 + $0x10] sm:$0xff]  }
 0x562   :  { %2357 = vmatprep.mubr.bf16.mxu0 %v3413_v36  ;;  %v3422_v29 = vld [vmem:[#allocation3 + $0x18] sm:$0xff]  }
 0x563   :  { %2358 = vmatmul.mubr.bf16.vlgmr.msra.gmra.mxu0 %v3416_v27 }
 0x564   :  { %2361 = vmatprep.mubr.bf16.mxu0 %v3418_v28  ;;  %2390 = vmatpush3.bf16.msra.mxu0 %v2575_v33 }
 0x565   :  { %2391 = vmatprep.subr.bf16.mxu0 %v2577_v35 }
 0x568   :  { %2392 = vmatpush3.bf16.msra.mxu0 %v2577_v35 }
 0x569   :  { %2393 = vmatprep.subr.bf16.mxu0 %v2579_v24 }
 0x56b   :  { %2362 = vmatmul.mubr.bf16.gmra.mxu0 %v3422_v29 }
 0x56c   :  { %2405 = vmatprep.mubr.bf16.mxu0 %v3413_v36  ;;  %2394 = vmatpush3.bf16.msra.mxu0 %v2579_v24 }
 0x623   :  { %v2359_v44 = vpop.f32.mrf.mxu0 }
 0x624   :  { %v1352_v48 = vadd.f32 %v2359_v44, %v2198_v45 }
 0x625   :  { %v1343_v46 = vpop.f32.mrf.mxu0 }
 0x626   :  { %v1344_v14 = vadd.f32 %v2198_v45, %v1343_v46 }
 0x627   :  { %v2360_v13 = vpop.f32.mrf.mxu0 }
 0x628   :  { %v1355_v15 = vadd.f32 %v2360_v13, %v2198_v45  ;;  %2595 = vtanh.f32 %v1344_v14 }
 0x629   :  { %v1346_v52 = vpop.f32.mrf.mxu0 }
 0x62a   :  { %v1347_v8 = vadd.f32 %v2198_v45, %v1346_v52  ;;  %2597 = vtanh.f32 %v1355_v15 }
 0x62b   :  { %v2363_v12 = vpop.f32.mrf.mxu0 }
 0x62c   :  { %2599 = vtanh.f32 %v1347_v8  ;;  %v1368_v20 = vadd.f32 %v2363_v12, %v2198_v45 }
 0x62d   :  { %2601 = vtanh.f32 %v1352_v48  ;;  %v1359_v16 = vpop.f32.mrf.mxu0 }
 0x62e   :  { %v1360_v17 = vadd.f32 %v2198_v45, %v1359_v16 }
 0x62f   :  { %v2364_v18 = vpop.f32.mrf.mxu0 }
 0x630   :  { %v1371_v19 = vadd.f32 %v2364_v18, %v2198_v45  ;;  %2603 = vtanh.f32 %v1360_v17  ;;  %v3573_v17 = vlaneseq }
 0x631   :  { %v1362_v21 = vpop.f32.mrf.mxu0 }
 0x632   :  { %v1363_v22 = vadd.f32 %v2198_v45, %v1362_v21  ;;  %2605 = vtanh.f32 %v1371_v19  ;;  %v1557_v18 = vand.u32 127, %v3573_v17 }
 0x634   :  { %2607 = vtanh.f32 %v1363_v22  ;;  %vm1558_vm1 = vcmp.eq.s32.totalorder %v1557_v18, 32 }
 0x635   :  { %2609 = vtanh.f32 %v1368_v20  ;;  %v2596_v47 = vpop.eup %2595 }
 0x637   :  { %v2598_v7 = vpop.eup %2597 }
 0x639   :  { %v2600_v50 = vpop.eup %2599 }
 0x63a   :  { %v2602_v2 = vpop.eup %2601  ;;  %v1382_v23 = vpack.c.bf16 %v2600_v50, %v2596_v47  ;;  %v1561_v47 = vunpack.c.l.bf16 %v3413_v36 }
 0x63b   :  { %v1383_v4 = vpack.c.bf16 %v2598_v7, %v2602_v2  ;;  %v2883_v7 = vmov 0.0   ;;  %v1562_v2 = vunpack.c.h.bf16 %v3413_v36 }
 0x63c   :  { %2381 = vmatprep.mubr.bf16.mxu1 %v1382_v23  ;;  %v2219_v50 = vsel %vm1558_vm1, 1.0, %v2883_v7  ;;  %v1563_v23 = vunpack.c.l.bf16 %v3416_v27  ;;  %v2588_v7 = vld [vmem:[#allocation13 + $0x8] sm:$0xff]  }
 0x63d   :  { %2382 = vmatmul.mubr.bf16.vlgmr.msra.gmra.mxu1 %v1383_v4  ;;  %v2604_v3 = vpop.eup %2603  ;;  %v1564_v4 = vunpack.c.h.bf16 %v3416_v27 }
 0x63e   :  { %2414 = vmatpush3.bf16.msra.mxu1 %v2576_v34 }
 0x63f   :  { %v2606_v9 = vpop.eup %2605  ;;  %2415 = vmatprep.subr.bf16.mxu1 %v2578_v37 }
 0x641   :  { %v2608_v10 = vpop.eup %2607 }
 0x642   :  { %v2610_v11 = vpop.eup %2609  ;;  %v1384_v1 = vpack.c.bf16 %v2608_v10, %v2604_v3  ;;  %2416 = vmatpush3.bf16.msra.mxu1 %v2578_v37  ;;  %v1569_v3 = vadd.f32 %v2219_v50, %v1561_v47  ;;  %v1570_v10 = vadd.f32 %v2219_v50, %v1562_v2  ;;  %v2587_v47 = vld [vmem:[#allocation15 + $0x8] sm:$0xff]   ;;  %v2589_v2 = vld [vmem:[#allocation15] sm:$0xff]  }
 0x643   :  { %v1385_v49 = vpack.c.bf16 %v2606_v9, %v2610_v11  ;;  %2417 = vmatprep.subr.bf16.mxu1 %v2580_v25  ;;  %v1565_v9 = vunpack.c.l.bf16 %v3418_v28  ;;  %v1566_v11 = vunpack.c.h.bf16 %v3418_v28 }
 0x644   :  { %2385 = vmatprep.mubr.bf16.mxu1 %v1384_v1  ;;  %v1571_v1 = vadd.f32 %v2219_v50, %v1563_v23  ;;  %v2590_v23 = vld [vmem:[#allocation13] sm:$0xff]  }
 0x645   :  { %2386 = vmatmul.mubr.bf16.gmra.mxu1 %v1385_v49  ;;  %v1567_v49 = vunpack.c.l.bf16 %v3422_v29  ;;  %v1573_v36 = vadd.f32 %v2219_v50, %v1565_v9 }
 0x646   :  { %2418 = vmatpush3.bf16.msra.mxu1 %v2580_v25 }
 0x6fd   :  { %v2383_v51 = vpop.f32.mrf.mxu1 }
 0x6ff   :  { %v1484_v53 = vpop.f32.mrf.mxu1 }
 0x701   :  { %v2384_v54 = vpop.f32.mrf.mxu1 }
 0x703   :  { %v1487_v55 = vpop.f32.mrf.mxu1 }
 0x705   :  { %v2387_v56 = vpop.f32.mrf.mxu1 }
 0x706   :  { %v1517_v61 = vmax.f32 %v2383_v51, %v2387_v56 }
 0x707   :  { %v1500_v57 = vpop.f32.mrf.mxu1 }
 0x708   :  { %v1515_v62 = vmax.f32 %v1484_v53, %v1500_v57 }
 0x709   :  { %v2388_v58 = vpop.f32.mrf.mxu1 }
 0x70a   :  { %v1518_v60 = vmax.f32 %v2384_v54, %v2388_v58 }
 0x70b   :  { %v1503_v41 = vpop.f32.mrf.mxu1 }
 0x70c   :  { %v1516_v59 = vmax.f32 %v1487_v55, %v1503_v41  ;;  %v1520_v0 = vmax.f32 %v1517_v61, %v1518_v60  ;;  %v1575_v61 = vadd.f32 %v2219_v50, %v1567_v49 }
 0x70e   :  { %v1519_v63 = vmax.f32 %v1515_v62, %v1516_v59 }
 0x710   :  { %v1521_v5 = vmax.f32 %v1519_v63, %v1520_v0 }
 0x712   :  { %1522 = vmax.xlane.f32.xlu0 %v1521_v5 }
 0x79b   :  { %v1523_v38 = vpop.xlane.xlu0 %1522 }
 0x79c   :  { %v1524_v39 = vrot.slane %v1523_v38, 4 }
 0x79e   :  { %v1525_v26 = vmax.f32 %v1523_v38, %v1524_v39 }
 0x7a0   :  { %v1526_v30 = vrot.slane %v1525_v26, 2 }
 0x7a2   :  { %v1527_v31 = vmax.f32 %v1525_v26, %v1526_v30 }
 0x7a4   :  { %v1528_v32 = vrot.slane %v1527_v31, 1 }
 0x7a6   :  { %v1529_v40 = vmax.f32 %v1527_v31, %v1528_v32 }
 0x7a8   :  { %2437 = vpush %v1529_v40 }
 0x7d9   :  { %s2438_s5 = spop %2437 }
 0x7da   :  { %v1531_v42 = vstv %s2438_s5 }
 0x7db   :  { %v1532_v43 = vsub.f32 %v1484_v53, %v1531_v42  ;;  %v1533_v44 = vsub.f32 %v1487_v55, %v1531_v42  ;;  %v1534_v45 = vsub.f32 %v2383_v51, %v1531_v42  ;;  %v1535_v46 = vsub.f32 %v2384_v54, %v1531_v42 }
 0x7dc   :  { %v1536_v14 = vsub.f32 %v1500_v57, %v1531_v42  ;;  %v1537_v13 = vsub.f32 %v1503_v41, %v1531_v42  ;;  %v1538_v15 = vsub.f32 %v2387_v56, %v1531_v42  ;;  %v1539_v12 = vsub.f32 %v2388_v58, %v1531_v42 }
 0x7dd   :  { %v1540_v48 = vmul.f32 1.442695, %v1532_v43  ;;  %v1542_v52 = vmul.f32 1.442695, %v1533_v44  ;;  %v1544_v8 = vmul.f32 1.442695, %v1534_v45  ;;  %v1572_v53 = vadd.f32 %v2219_v50, %v1564_v4 }
 0x7de   :  { %v1546_v16 = vmul.f32 1.442695, %v1535_v46  ;;  %v1548_v19 = vmul.f32 1.442695, %v1536_v14  ;;  %v1550_v20 = vmul.f32 1.442695, %v1537_v13  ;;  %v1568_v54 = vunpack.c.h.bf16 %v3422_v29 }
 0x7df   :  { %2611 = vpow2.f32 %v1540_v48  ;;  %v1552_v21 = vmul.f32 1.442695, %v1538_v15  ;;  %v1554_v22 = vmul.f32 1.442695, %v1539_v12  ;;  %v1574_v58 = vadd.f32 %v2219_v50, %v1566_v11  ;;  %v2581_v14 = vld [vmem:[#allocation15 + $0x20] sm:$0xff]   ;;  %v2583_v12 = vld [vmem:[#allocation15 + $0x18] sm:$0xff]  }
 0x7e0   :  { %2613 = vpow2.f32 %v1542_v52  ;;  %v1576_v63 = vadd.f32 %v2219_v50, %v1568_v54  ;;  %v2582_v13 = vld [vmem:[#allocation13 + $0x20] sm:$0xff]   ;;  %2395 = vmatprep.subr.bf16.mxu0 %v2581_v14 }
 0x7e1   :  { %2615 = vpow2.f32 %v1544_v8  ;;  %2419 = vmatprep.subr.bf16.mxu1 %v2582_v13  ;;  %2396 = vmatpush3.bf16.msra.mxu0 %v2581_v14 }
 0x7e2   :  { %2617 = vpow2.f32 %v1546_v16  ;;  %2420 = vmatpush3.bf16.msra.mxu1 %v2582_v13  ;;  %v2584_v16 = vld [vmem:[#allocation13 + $0x18] sm:$0xff]   ;;  %2397 = vmatprep.subr.bf16.mxu0 %v2583_v12 }
 0x7e3   :  { %2619 = vpow2.f32 %v1548_v19  ;;  %2421 = vmatprep.subr.bf16.mxu1 %v2584_v16 }
 0x7e4   :  { %2621 = vpow2.f32 %v1550_v20  ;;  %v2585_v20 = vld [vmem:[#allocation15 + $0x10] sm:$0xff]  }
 0x7e5   :  { %2623 = vpow2.f32 %v1552_v21  ;;  %2398 = vmatpush3.bf16.msra.mxu0 %v2583_v12  ;;  %v2586_v21 = vld [vmem:[#allocation13 + $0x10] sm:$0xff]   ;;  %v2236_v12 = vld [vmem:[%s3498_s9] ss:$0 sm:$0xff]  ;;  %s2884_s9 = smov [#allocation16]  }
 0x7e6   :  { %2625 = vpow2.f32 %v1554_v22  ;;  %2422 = vmatpush3.bf16.msra.mxu1 %v2584_v16  ;;  %2399 = vmatprep.subr.bf16.mxu0 %v2585_v20  ;;  %s2043_s15 = sshll.u32 %s2884_s9, 4  ;;  %s2044_s15 = int_to_ptr.vmem [resolvable:$true] %s2043_s15 }
 0x7e7   :  { %2423 = vmatprep.subr.bf16.mxu1 %v2586_v21  ;;  %s2815_s18 = scalar_lea.vmem %s2044_s15, 512  ;;  %p2820_p9 = scmp.lt.s32.totalorder %s2044_s15, %s2044_s15 }
 0x7e8   :  { %p2816_p8 = scmp.ne.s32.totalorder %s2044_s15, %s2815_s18  ;;  %p2821_p10 = scmp.lt.s32.totalorder %s2815_s18, %s2815_s18 }
 0x7e9   :  { %2400 = vmatpush3.bf16.msra.mxu0 %v2585_v20 }
 0x7ea   :  { %2424 = vmatpush3.bf16.msra.mxu1 %v2586_v21  ;;  %2401 = vmatprep.subr.bf16.mxu0 %v2587_v47  ;;  %p2822_p11 = por %p2821_p10, %p2820_p9 }
 0x7eb   :  { %2425 = vmatprep.subr.bf16.mxu1 %v2588_v7 }
 0x7ec   :  { %v2612_v51 = vpop.eup %2611  ;;  %p2823_p12 = pnand %p2822_p11, %p2816_p8 }
 0x7ed   :  { %v2614_v55 = vpop.eup %2613  ;;  %v3438_v56 = vmul.f32 %v2612_v51, %v1569_v3  ;;  %2402 = vmatpush3.bf16.msra.mxu0 %v2587_v47 }
 0x7ee   :  { %v2616_v57 = vpop.eup %2615  ;;  %v1578_v60 = vmul.f32 %v2614_v55, %v1570_v10  ;;  %2426 = vmatpush3.bf16.msra.mxu1 %v2588_v7  ;;  %2403 = vmatprep.subr.bf16.mxu0 %v2589_v2 }
 0x7ef   :  { %v2618_v41 = vpop.eup %2617  ;;  %2627 = vrcp.f32 %v3438_v56  ;;  %v1579_v62 = vmul.f32 %v2616_v57, %v1571_v1  ;;  %2427 = vmatprep.subr.bf16.mxu1 %v2590_v23 }
 0x7f0   :  { %v2620_v59 = vpop.eup %2619  ;;  %v1580_v0 = vmul.f32 %v2618_v41, %v1572_v53  ;;  %v3442_v5 = vadd.f32 %v1578_v60, %v3438_v56 }
 0x7f1   :  { %v2622_v6 = vpop.eup %2621  ;;  %v1581_v33 = vmul.f32 %v2620_v59, %v1573_v36  ;;  %v1587_v34 = vadd.f32 %v1579_v62, %v1578_v60  ;;  %2404 = vmatpush3.bf16.msra.mxu0 %v2589_v2 }
 0x7f2   :  { %v2624_v35 = vpop.eup %2623  ;;  %v1582_v37 = vmul.f32 %v2622_v6, %v1574_v58  ;;  %v1588_v38 = vadd.f32 %v1580_v0, %v1579_v62  ;;  %2629 = vrcp.f32 %v3442_v5  ;;  %2428 = vmatpush3.bf16.msra.mxu1 %v2590_v23 }
 0x7f3   :  { %v2626_v39 = vpop.eup %2625  ;;  %v1583_v24 = vmul.f32 %v2624_v35, %v1575_v61  ;;  %v1589_v25 = vadd.f32 %v1581_v33, %v1580_v0  ;;  %v3446_v26 = vadd.f32 %v1587_v34, %v3438_v56 }
 0x7f4   :  { %v1584_v30 = vmul.f32 %v2626_v39, %v1576_v63  ;;  %v1590_v31 = vadd.f32 %v1582_v37, %v1581_v33  ;;  %v3449_v44 = vadd.f32 %v1588_v38, %v3442_v5  ;;  %2406 = vmatmul.mubr.bf16.vlgmr.msra.gmra.mxu0 %v3416_v27 }
 0x7f5   :  { %v1591_v32 = vadd.f32 %v1583_v24, %v1582_v37  ;;  %v1597_v40 = vadd.f32 %v1589_v25, %v1587_v34  ;;  %2631 = vrcp.f32 %v3446_v26  ;;  %2409 = vmatprep.mubr.bf16.mxu0 %v3418_v28 }
 0x7f6   :  { %v1592_v42 = vadd.f32 %v1584_v30, %v1583_v24  ;;  %v1598_v43 = vadd.f32 %v1590_v31, %v1588_v38  ;;  %2633 = vrcp.f32 %v3449_v44 }
 0x7f7   :  { %v1599_v45 = vadd.f32 %v1591_v32, %v1589_v25  ;;  %v3453_v15 = vadd.f32 %v1597_v40, %v3438_v56 }
 0x7f8   :  { %v1600_v46 = vadd.f32 %v1592_v42, %v1590_v31  ;;  %v3457_v52 = vadd.f32 %v1598_v43, %v3442_v5 }
 0x7f9   :  { %2635 = vrcp.f32 %v3453_v15  ;;  %v3461_v17 = vadd.f32 %v1599_v45, %v3446_v26 }
 0x7fa   :  { %2637 = vrcp.f32 %v3457_v52  ;;  %v3466_v19 = vadd.f32 %v1600_v46, %v3449_v44 }
 0x7fb   :  { %2639 = vrcp.f32 %v3461_v17 }
 0x7fc   :  { %v2628_v48 = vpop.eup %2627  ;;  %2641 = vrcp.f32 %v3466_v19  ;;  %2410 = vmatmul.mubr.bf16.gmra.mxu0 %v3422_v29 }
 0x7fd   :  { %1619 = vperm.xlu0 %2553, %v2628_v48  }
 0x7ff   :  { %v2630_v8 = vpop.eup %2629 }
 0x800   :  { %1624 = vperm.xlu1 %2554, %v2630_v8  }
 0x802   :  { %v2632_v18 = vpop.eup %2631 }
 0x803   :  { %v2634_v22 = vpop.eup %2633 }
 0x804   :  { %1629 = vperm.xlu1 %2554, %v2632_v18  }
 0x806   :  { %v2636_v50 = vpop.eup %2635 }
 0x807   :  { %v2638_v4 = vpop.eup %2637 }
 0x808   :  { %1634 = vperm.xlu1 %2554, %v2634_v22   ;;  %v2640_v3 = vpop.eup %2639 }
 0x809   :  { %v2642_v9 = vpop.eup %2641 }
 0x80c   :  { %1639 = vperm.xlu1 %2554, %v2636_v50  }
 0x810   :  { %1644 = vperm.xlu1 %2554, %v2638_v4  }
 0x814   :  { %1649 = vperm.xlu1 %2554, %v2640_v3  }
 0x818   :  { %1654 = vperm.xlu1 %2554, %v2642_v9  }
 0x878   :  { %v1620_v10 = vpop.permute.xlu0 %1619 }
 0x879   :  { %v1657_v1 = vmul.f32 %v1620_v10, %v3438_v56 }
 0x87b   :  { %v1625_v11 = vpop.permute.xlu1 %1624  ;;  %v1689_v36 = vsub.f32 %v1657_v1, %v1657_v1 }
 0x87c   :  { %v1658_v49 = vmul.f32 %v1625_v11, %v3442_v5 }
 0x87e   :  { %v1666_v51 = vadd.f32 %v1658_v49, %v1657_v1 }
 0x87f   :  { %v1630_v53 = vpop.permute.xlu1 %1629 }
 0x880   :  { %v1690_v54 = vsub.f32 %v1666_v51, %v1658_v49  ;;  %v1659_v55 = vmul.f32 %v1630_v53, %v3446_v26 }
 0x882   :  { %v1667_v57 = vadd.f32 %v1659_v55, %v1658_v49  ;;  %v1697_v27 = vpack.c.bf16 %v1690_v54, %v1689_v36 }
 0x883   :  { %v1635_v58 = vpop.permute.xlu1 %1634 }
 0x884   :  { %v1660_v28 = vmul.f32 %v1635_v58, %v3449_v44  ;;  %2429 = vmatprep.mubr.bf16.mxu1 %v1697_v27  ;;  %v1675_v60 = vadd.f32 %v1667_v57, %v1657_v1 }
 0x886   :  { %v1668_v29 = vadd.f32 %v1660_v28, %v1659_v55  ;;  %v1691_v62 = vsub.f32 %v1675_v60, %v1659_v55 }
 0x887   :  { %v1640_v41 = vpop.permute.xlu1 %1639 }
 0x888   :  { %v1676_v61 = vadd.f32 %v1668_v29, %v1666_v51  ;;  %v1661_v56 = vmul.f32 %v1640_v41, %v3453_v15 }
 0x88a   :  { %v1692_v59 = vsub.f32 %v1676_v61, %v1660_v28  ;;  %v1669_v63 = vadd.f32 %v1661_v56, %v1660_v28 }
 0x88b   :  { %v1645_v0 = vpop.permute.xlu1 %1644 }
 0x88c   :  { %v1698_v5 = vpack.c.bf16 %v1692_v59, %v1691_v62  ;;  %v1677_v6 = vadd.f32 %v1669_v63, %v1667_v57  ;;  %v1662_v33 = vmul.f32 %v1645_v0, %v3457_v52 }
 0x88e   :  { %v1670_v34 = vadd.f32 %v1662_v33, %v1661_v56  ;;  %2430 = vmatmul.mubr.bf16.vlgmr.msra.gmra.mxu1 %v1698_v5  ;;  %v1685_v37 = vadd.f32 %v1677_v6, %v1657_v1 }
 0x88f   :  { %v1650_v35 = vpop.permute.xlu1 %1649 }
 0x890   :  { %v1678_v38 = vadd.f32 %v1670_v34, %v1668_v29  ;;  %v1663_v39 = vmul.f32 %v1650_v35, %v3461_v17  ;;  %v1693_v30 = vsub.f32 %v1685_v37, %v1661_v56 }
 0x892   :  { %v1686_v24 = vadd.f32 %v1678_v38, %v1666_v51  ;;  %v1671_v25 = vadd.f32 %v1663_v39, %v1662_v33 }
 0x893   :  { %v1655_v26 = vpop.permute.xlu1 %1654 }
 0x894   :  { %v1694_v31 = vsub.f32 %v1686_v24, %v1662_v33  ;;  %v1679_v32 = vadd.f32 %v1671_v25, %v1669_v63  ;;  %v1664_v40 = vmul.f32 %v1655_v26, %v3466_v19 }
 0x896   :  { %v1672_v42 = vadd.f32 %v1664_v40, %v1663_v39  ;;  %v1699_v43 = vpack.c.bf16 %v1694_v31, %v1693_v30  ;;  %v1687_v44 = vadd.f32 %v1679_v32, %v1675_v60 }
 0x898   :  { %v1680_v45 = vadd.f32 %v1672_v42, %v1670_v34  ;;  %2433 = vmatprep.mubr.bf16.mxu1 %v1699_v43  ;;  %v1695_v14 = vsub.f32 %v1687_v44, %v1663_v39 }
 0x89a   :  { %v1688_v46 = vadd.f32 %v1680_v45, %v1676_v61 }
 0x89c   :  { %v1696_v13 = vsub.f32 %v1688_v46, %v1664_v40 }
 0x89e   :  { %v1700_v15 = vpack.c.bf16 %v1696_v13, %v1695_v14 }
 0x8a0   :  { %2434 = vmatmul.mubr.bf16.gmra.mxu1 %v1700_v15 }
 0x8b4   :  { %v2407_v48 = vpop.f32.mrf.mxu0 }
 0x8b6   :  { %v1815_v52 = vpop.f32.mrf.mxu0 }
 0x8b8   :  { %v2408_v16 = vpop.f32.mrf.mxu0 }
 0x8ba   :  { %v1818_v22 = vpop.f32.mrf.mxu0 }
 0x8bc   :  { %v2411_v1 = vpop.f32.mrf.mxu0 }
 0x8be   :  { %v1831_v49 = vpop.f32.mrf.mxu0 }
 0x8c0   :  { %v2412_v55 = vpop.f32.mrf.mxu0 }
 0x8c2   :  { %v1834_v62 = vpop.f32.mrf.mxu0 }
 0x94e   :  { %v2431_v8 = vpop.f32.mrf.mxu1 }
 0x94f   :  { %v1937_v17 = vadd.f32 %v2431_v8, %v2407_v48 }
 0x950   :  { %v1928_v18 = vpop.f32.mrf.mxu1 }
 0x951   :  { %v1968_v19 = vadd.f32 %v2236_v12, %v1937_v17  ;;  %v1929_v20 = vadd.f32 %v1928_v18, %v1815_v52 }
 0x952   :  { %v2432_v21 = vpop.f32.mrf.mxu1 }
 0x953   :  { %v2239_v47 = vmul.f32 -1.442695, %v1968_v19  ;;  %v1966_v7 = vadd.f32 %v2236_v12, %v1929_v20  ;;  %v1940_v50 = vadd.f32 %v2432_v21, %v2408_v16 }
 0x954   :  { %v1931_v2 = vpop.f32.mrf.mxu1 }
 0x955   :  { %2643 = vpow2.f32 %v2239_v47  ;;  %v2237_v23 = vmul.f32 -1.442695, %v1966_v7  ;;  %v1969_v4 = vadd.f32 %v2236_v12, %v1940_v50  ;;  %v1932_v3 = vadd.f32 %v1931_v2, %v1818_v22 }
 0x957   :  { %2645 = vpow2.f32 %v2237_v23  ;;  %v2240_v9 = vmul.f32 -1.442695, %v1969_v4  ;;  %v1967_v10 = vadd.f32 %v2236_v12, %v1932_v3 }
 0x959   :  { %2647 = vpow2.f32 %v2240_v9  ;;  %v2238_v11 = vmul.f32 -1.442695, %v1967_v10 }
 0x95b   :  { %2649 = vpow2.f32 %v2238_v11 }
 0x960   :  { %v2435_v51 = vpop.f32.mrf.mxu1 }
 0x961   :  { %v1953_v53 = vadd.f32 %v2435_v51, %v2411_v1 }
 0x962   :  { %v2644_v54 = vpop.eup %2643  ;;  %v1944_v36 = vpop.f32.mrf.mxu1 }
 0x963   :  { %v2000_v57 = vadd.f32 1.0, %v2644_v54  ;;  %v1972_v27 = vadd.f32 %v2236_v12, %v1953_v53  ;;  %v1945_v58 = vadd.f32 %v1944_v36, %v1831_v49 }
 0x964   :  { %v2646_v28 = vpop.eup %2645  ;;  %v2436_v60 = vpop.f32.mrf.mxu1 }
 0x965   :  { %v1998_v29 = vadd.f32 1.0, %v2646_v28  ;;  %v2243_v41 = vmul.f32 -1.442695, %v1972_v27  ;;  %v1970_v61 = vadd.f32 %v2236_v12, %v1945_v58  ;;  %2651 = vrcp.f32 %v2000_v57 }
 0x966   :  { %v2648_v56 = vpop.eup %2647  ;;  %v1956_v59 = vadd.f32 %v2436_v60, %v2412_v55  ;;  %v1947_v63 = vpop.f32.mrf.mxu1 }
 0x967   :  { %2653 = vrcp.f32 %v1998_v29  ;;  %v2001_v0 = vadd.f32 1.0, %v2648_v56  ;;  %v2241_v5 = vmul.f32 -1.442695, %v1970_v61  ;;  %v1948_v6 = vadd.f32 %v1947_v63, %v1834_v62 }
 0x968   :  { %v2650_v33 = vpop.eup %2649  ;;  %2655 = vpow2.f32 %v2243_v41  ;;  %v1973_v34 = vadd.f32 %v2236_v12, %v1956_v59 }
 0x969   :  { %2657 = vrcp.f32 %v2001_v0  ;;  %v1999_v35 = vadd.f32 1.0, %v2650_v33  ;;  %v1971_v37 = vadd.f32 %v2236_v12, %v1948_v6 }
 0x96a   :  { %2659 = vpow2.f32 %v2241_v5  ;;  %v2244_v38 = vmul.f32 -1.442695, %v1973_v34 }
 0x96b   :  { %2661 = vrcp.f32 %v1999_v35  ;;  %v2242_v39 = vmul.f32 -1.442695, %v1971_v37 }
 0x96c   :  { %2663 = vpow2.f32 %v2244_v38 }
 0x96d   :  { %2665 = vpow2.f32 %v2242_v39 }
 0x972   :  { %v2652_v24 = vpop.eup %2651 }
 0x974   :  { %v2654_v25 = vpop.eup %2653 }
 0x975   :  { %v2656_v26 = vpop.eup %2655 }
 0x976   :  { %v2658_v30 = vpop.eup %2657  ;;  %v2004_v31 = vadd.f32 1.0, %v2656_v26 }
 0x977   :  { %v2660_v32 = vpop.eup %2659  ;;  %v2278_v40 = vpack.c.bf16 %v2658_v30, %v2652_v24 }
 0x978   :  { %v2662_v42 = vpop.eup %2661  ;;  %v2002_v43 = vadd.f32 1.0, %v2660_v32  ;;  %2667 = vrcp.f32 %v2004_v31 }
 0x979   :  { %v2664_v44 = vpop.eup %2663  ;;  %v2273_v45 = vpack.c.bf16 %v2662_v42, %v2654_v25  ;;  %2290 = vst [vmem:[#allocation16 + $0x8] sm:$0xff] %v2278_v40  }
 0x97a   :  { %v2666_v46 = vpop.eup %2665  ;;  %v2005_v14 = vadd.f32 1.0, %v2664_v44  ;;  %2669 = vrcp.f32 %v2002_v43 }
 0x97b   :  { %v2003_v13 = vadd.f32 1.0, %v2666_v46  ;;  %2274 = vst [vmem:[#allocation16] sm:$0xff] %v2273_v45  }
 0x97c   :  { %2671 = vrcp.f32 %v2005_v14 }
 0x97d   :  { %2673 = vrcp.f32 %v2003_v13 }
 0x985   :  { %v2668_v15 = vpop.eup %2667 }
 0x987   :  { %v2670_v48 = vpop.eup %2669 }
 0x989   :  { %v2672_v52 = vpop.eup %2671 }
 0x98a   :  { %v2674_v8 = vpop.eup %2673  ;;  %v2288_v12 = vpack.c.bf16 %v2672_v52, %v2668_v15 }
 0x98b   :  { %v2283_v16 = vpack.c.bf16 %v2674_v8, %v2670_v48 }
 0x98c   :  { %2292 = vst [vmem:[#allocation16 + $0x18] sm:$0xff] %v2288_v12  }
 0x98d   :  { %2291 = vst [vmem:[#allocation16 + $0x10] sm:$0xff] %v2283_v16  }
 0x98e   :  { %2826 = shalt.err (!%p2823_p12)
}
 0x98f   :  { %2049 = dma.vmem_to_hbm [thread:$0]  %s2044_s15, 512, %s3499_s10, [#allocation6], %s2874_s25, %s2874_s25, %s2875_s26  }
 0x990   :  { %2855 = dma.done.wait [#allocation6], 512  }
 0x991   :  { %2856 = vsyncadd [#allocation6], 4294966784 }
 0x992   :  { %2053 = vsyncpa [#allocation5], 1 }
 0x993   :  { %2054 = vsyncpa [#allocation8], 1 }
 0x994   :  { %2055 = vsyncpa [#allocation11], 1 }
 0x995   :  { %2056 = vsyncpa [#allocation14], 1 }
 0x996   :  { %2057 = vsyncpa [#allocation6], 1 }

</bundles_post_ra>
